<compile_context>
chip_gen: v6e
topology: v6e:2x2x1
jax: 0.10.0
libtpu: 0.0.40
codegen_flags: <defaults>
</compile_context>

<pallas_src>
import jax
import jax.numpy as jnp
from jax import lax
from jax.experimental import pallas as pl
from jax.experimental.pallas import tpu as pltpu

SUBLANES = 8
LANES = 128


def _make_kernel(seq_len, batch_pad, hidden):
    S = seq_len
    B = batch_pad
    H = hidden

    def kernel(x_ref, wih1_ref, whh1_ref, b1_ref,
               wih2_ref, whh2_ref, b2_ref, wfc_ref, bfc_ref, out_ref):
        """
        x_ref   : (S*B, I)    f32 flattened padded input sequence
        wih1    : (I, 4H)     bf16 layer-1 input->gates (transposed)
        whh1    : (H, 4H)     bf16 layer-1 hidden->gates (transposed)
        b1      : (1, 4H)     f32  layer-1 combined bias (b_ih + b_hh)
        wih2    : (H, 4H)     bf16 layer-2 input->gates (transposed)
        whh2    : (H, 4H)     bf16 layer-2 hidden->gates (transposed)
        b2      : (1, 4H)     f32  layer-2 combined bias
        wfc     : (H, 128)    bf16 final linear weight, zero-padded lanes
        bfc     : (1, 128)    f32  final linear bias, zero-padded lanes
        out_ref : (S*B, 128)  f32  lane-dense output slab (col 0..O-1 real)
        """
        # ---- hoisted layer-1 input projection for all timesteps (off the
        # critical path; kept in registers: (S*B, 4H) f32 = 8 vregs). ----
        xg1 = (jnp.dot(x_ref[...].astype(jnp.bfloat16), wih1_ref[...],
                       preferred_element_type=jnp.float32)
               + b1_ref[...])

        # Hoist weight / bias loads out of the recurrence.
        whh1 = whh1_ref[...]
        wih2 = wih2_ref[...]
        whh2 = whh2_ref[...]
        b2 = b2_ref[...]

        def gates_to_hc(g, c_prev):
            # One full-width sigmoid + one full-width tanh on the (B, 4H=128)
            # tile (exactly one f32 vreg each); elementwise math stays f32.
            sig = jax.nn.sigmoid(g)
            th = jnp.tanh(g)
            i_g = sig[:, 0 * H:1 * H]
            f_g = sig[:, 1 * H:2 * H]
            g_g = th[:, 2 * H:3 * H]
            o_g = sig[:, 3 * H:4 * H]
            c_new = f_g * c_prev + i_g * g_g
            h_new = o_g * jnp.tanh(c_new)
            return h_new, c_new

        z = jnp.zeros((B, H), jnp.float32)
        h1, c1, h2, c2 = z, z, z, z
        h2_hist = []

        # Fully unrolled recurrence (S is small & static) -> static slices,
        # no scratch traffic on the serial chain.
        for t in range(S):
            # Layer-2 recurrent term first: only depends on previous h2, so
            # the MXU push overlaps layer-1's matmul / EUP work below.
            g2_partial = jnp.dot(h2.astype(jnp.bfloat16), whh2,
                                 preferred_element_type=jnp.float32) + b2

            # ---- layer 1: only the recurrent matmul is on the serial chain --
            g1 = xg1[t * B:(t + 1) * B, :] + jnp.dot(
                h1.astype(jnp.bfloat16), whh1,
                preferred_element_type=jnp.float32)
            h1, c1 = gates_to_hc(g1, c1)

            # ---- layer 2: input matmul + precomputed recurrent term --------
            g2 = jnp.dot(h1.astype(jnp.bfloat16), wih2,
                         preferred_element_type=jnp.float32) + g2_partial
            h2, c2 = gates_to_hc(g2, c2)
            h2_hist.append(h2)

        # Dropout(p=0.5) in eval mode is identity.
        # Deferred final FC: one (S*B, H) @ (H, 128) matmul, lane-dense store.
        h2_all = jnp.concatenate(h2_hist, axis=0).astype(jnp.bfloat16)
        out_ref[...] = (jnp.dot(h2_all, wfc_ref[...],
                                preferred_element_type=jnp.float32)
                        + bfc_ref[...]).astype(out_ref.dtype)

    return kernel


def lstm_regression_forward(x, params):
    """x: (S, B, I) float32.  Returns (S, B, O)."""
    S, B, I = x.shape
    H = params["whh1_t"].shape[0]
    O = params["wfc_t"].shape[1]
    O_pad = LANES  # lane-dense output slab

    # Pad batch to the sublane width so all (B, *) tiles are full 8-sublane tiles.
    B_pad = max(SUBLANES, pl.cdiv(B, SUBLANES) * SUBLANES)
    x_pad = jnp.zeros((S, B_pad, I), x.dtype).at[:, :B, :].set(x)
    x_flat = x_pad.reshape(S * B_pad, I)

    # bf16 matmul operands (f32 accumulation in-kernel), lane-padded FC.
    wih1_bf = params["wih1_t"].astype(jnp.bfloat16)
    whh1_bf = params["whh1_t"].astype(jnp.bfloat16)
    wih2_bf = params["wih2_t"].astype(jnp.bfloat16)
    whh2_bf = params["whh2_t"].astype(jnp.bfloat16)
    wfc_pad = (jnp.zeros((H, O_pad), jnp.float32)
               .at[:, :O].set(params["wfc_t"])).astype(jnp.bfloat16)
    bfc_pad = jnp.zeros((1, O_pad), jnp.float32).at[:, :O].set(params["bfc"])

    args = (
        x_flat,
        wih1_bf, whh1_bf, params["b1"],
        wih2_bf, whh2_bf, params["b2"],
        wfc_pad, bfc_pad,
    )
    vmem = pl.BlockSpec(memory_space=pltpu.MemorySpace.VMEM)
    out_flat = pl.pallas_call(
        _make_kernel(S, B_pad, H),
        out_shape=jax.ShapeDtypeStruct((S * B_pad, O_pad), jnp.float32),
        in_specs=[vmem] * len(args),
        out_specs=vmem,
    )(*args)
    # TODO(synk): for large B / many independent sequences, add a leading
    # batch grid axis with dimension_semantics=("parallel",) (v7x dual-TC) and
    # sequence tiling of the hoisted projection to respect v7x's 64 MiB VMEM;
    # unnecessary at this size (<0.2 MiB resident).
    return out_flat[:, :O].reshape(S, B_pad, O)[:, :B, :]


def make_params(key, input_size, hidden_size, output_size):
    """Deterministic synthetic parameters with PyTorch-style shapes,
    pre-transposed for the kernel (kept in f32; kernel wrapper casts to bf16)."""
    H, I, O = hidden_size, input_size, output_size
    ks = jax.random.split(key, 10)
    scale = 0.1

    # PyTorch shapes: W_ih_l0 (4H, I), W_hh_l0 (4H, H), b_* (4H,)
    w_ih1 = scale * jax.random.normal(ks[0], (4 * H, I), jnp.float32)
    w_hh1 = scale * jax.random.normal(ks[1], (4 * H, H), jnp.float32)
    b_ih1 = scale * jax.random.normal(ks[2], (4 * H,), jnp.float32)
    b_hh1 = scale * jax.random.normal(ks[3], (4 * H,), jnp.float32)

    w_ih2 = scale * jax.random.normal(ks[4], (4 * H, H), jnp.float32)
    w_hh2 = scale * jax.random.normal(ks[5], (4 * H, H), jnp.float32)
    b_ih2 = scale * jax.random.normal(ks[6], (4 * H,), jnp.float32)
    b_hh2 = scale * jax.random.normal(ks[7], (4 * H,), jnp.float32)

    w_fc = scale * jax.random.normal(ks[8], (O, H), jnp.float32)
    b_fc = scale * jax.random.normal(ks[9], (O,), jnp.float32)

    return {
        "wih1_t": w_ih1.T, "whh1_t": w_hh1.T, "b1": (b_ih1 + b_hh1)[None, :],
        "wih2_t": w_ih2.T, "whh2_t": w_hh2.T, "b2": (b_ih2 + b_hh2)[None, :],
        "wfc_t": w_fc.T, "bfc": b_fc[None, :],
    }


def reference_forward(x, params):
    """Pure-JAX f32 reference of the same math (for a correctness check)."""
    S, B, I = x.shape
    H = params["whh1_t"].shape[0]

    def gates_to_hc(g, c_prev):
        i_g = jax.nn.sigmoid(g[:, 0 * H:1 * H])
        f_g = jax.nn.sigmoid(g[:, 1 * H:2 * H])
        g_g = jnp.tanh(g[:, 2 * H:3 * H])
        o_g = jax.nn.sigmoid(g[:, 3 * H:4 * H])
        c = f_g * c_prev + i_g * g_g
        return o_g * jnp.tanh(c), c

    def scan_fn(carry, x_t):
        h1, c1, h2, c2 = carry
        g1 = x_t @ params["wih1_t"] + h1 @ params["whh1_t"] + params["b1"]
        h1, c1 = gates_to_hc(g1, c1)
        g2 = h1 @ params["wih2_t"] + h2 @ params["whh2_t"] + params["b2"]
        h2, c2 = gates_to_hc(g2, c2)
        y = h2 @ params["wfc_t"] + params["bfc"]
        return (h1, c1, h2, c2), y

    z = jnp.zeros((B, H), jnp.float32)
    _, ys = lax.scan(scan_fn, (z, z, z, z), x)
    return ys


if __name__ == "__main__":
    SEQ, BATCH = 8, 2
    INPUT_SIZE, HIDDEN_SIZE, OUTPUT_SIZE = 4, 32, 1

    key = jax.random.PRNGKey(0)
    k_x, k_p = jax.random.split(key)
    x = jax.random.normal(k_x, (SEQ, BATCH, INPUT_SIZE), jnp.float32)
    params = make_params(k_p, INPUT_SIZE, HIDDEN_SIZE, OUTPUT_SIZE)

    out = lstm_regression_forward(x, params)
    out = jax.block_until_ready(out)

    ref = reference_forward(x, params)
    assert out.shape == (SEQ, BATCH, OUTPUT_SIZE)
    # Tolerance loosened for bf16 MXU inputs (f32 accumulation).
    assert jnp.allclose(out, ref, atol=2e-2, rtol=2e-2), (
        float(jnp.max(jnp.abs(out - ref))))

    print("KERNEL_OK")
</pallas_src>

<mosaic_0001>
module attributes {stable_mosaic.version = 11 : i64} {
  func.func @kernel(%arg0: memref<64x4xf32, #tpu.memory_space<vmem>>, %arg1: memref<4x128xbf16, #tpu.memory_space<vmem>>, %arg2: memref<32x128xbf16, #tpu.memory_space<vmem>>, %arg3: memref<1x128xf32, #tpu.memory_space<vmem>>, %arg4: memref<32x128xbf16, #tpu.memory_space<vmem>>, %arg5: memref<32x128xbf16, #tpu.memory_space<vmem>>, %arg6: memref<1x128xf32, #tpu.memory_space<vmem>>, %arg7: memref<32x128xbf16, #tpu.memory_space<vmem>>, %arg8: memref<1x128xf32, #tpu.memory_space<vmem>>, %arg9: memref<64x128xf32, #tpu.memory_space<vmem>>) attributes {dimension_semantics = [], scalar_prefetch = 0 : i64, scratch_operands = 0 : i64, tpu.core_type = #tpu.core_type<tc>} {
    %c0 = arith.constant 0 : index
    %c0_0 = arith.constant 0 : index
    %0 = vector.load %arg0[%c0, %c0_0] : memref<64x4xf32, #tpu.memory_space<vmem>>, vector<64x4xf32>
    %1 = arith.truncf %0 : vector<64x4xf32> to vector<64x4xbf16>
    %c0_1 = arith.constant 0 : index
    %c0_2 = arith.constant 0 : index
    %2 = vector.load %arg1[%c0_1, %c0_2] : memref<4x128xbf16, #tpu.memory_space<vmem>>, vector<4x128xbf16>
    %cst = arith.constant dense<0.000000e+00> : vector<64x128xf32>
    %3 = tpu.matmul %1, %2, %cst {dimension_numbers = #tpu.dot_dimension_numbers<[1], [0], [0], [1], [0, 0, 1, 1], [], []>} : vector<64x4xbf16>, vector<4x128xbf16>, vector<64x128xf32> -> vector<64x128xf32>
    %c0_3 = arith.constant 0 : index
    %c0_4 = arith.constant 0 : index
    %4 = vector.load %arg3[%c0_3, %c0_4] : memref<1x128xf32, #tpu.memory_space<vmem>>, vector<1x128xf32>
    %5 = vector.broadcast %4 : vector<1x128xf32> to vector<64x128xf32>
    %6 = arith.addf %3, %5 : vector<64x128xf32>
    %c0_5 = arith.constant 0 : index
    %c0_6 = arith.constant 0 : index
    %7 = vector.load %arg2[%c0_5, %c0_6] : memref<32x128xbf16, #tpu.memory_space<vmem>>, vector<32x128xbf16>
    %c0_7 = arith.constant 0 : index
    %c0_8 = arith.constant 0 : index
    %8 = vector.load %arg4[%c0_7, %c0_8] : memref<32x128xbf16, #tpu.memory_space<vmem>>, vector<32x128xbf16>
    %c0_9 = arith.constant 0 : index
    %c0_10 = arith.constant 0 : index
    %9 = vector.load %arg5[%c0_9, %c0_10] : memref<32x128xbf16, #tpu.memory_space<vmem>>, vector<32x128xbf16>
    %c0_11 = arith.constant 0 : index
    %c0_12 = arith.constant 0 : index
    %10 = vector.load %arg6[%c0_11, %c0_12] : memref<1x128xf32, #tpu.memory_space<vmem>>, vector<1x128xf32>
    %cst_13 = arith.constant 0.000000e+00 : f32
    %11 = vector.broadcast %cst_13 : f32 to vector<8x32xf32>
    %12 = arith.truncf %11 : vector<8x32xf32> to vector<8x32xbf16>
    %cst_14 = arith.constant dense<0.000000e+00> : vector<8x128xf32>
    %13 = tpu.matmul %12, %9, %cst_14 {dimension_numbers = #tpu.dot_dimension_numbers<[1], [0], [0], [1], [0, 0, 1, 1], [], []>} : vector<8x32xbf16>, vector<32x128xbf16>, vector<8x128xf32> -> vector<8x128xf32>
    %14 = vector.broadcast %10 : vector<1x128xf32> to vector<8x128xf32>
    %15 = arith.addf %13, %14 : vector<8x128xf32>
    %16 = vector.extract_strided_slice %6 {offsets = [0, 0], sizes = [8, 128], strides = [1, 1]} : vector<64x128xf32> to vector<8x128xf32>
    %17 = arith.truncf %11 : vector<8x32xf32> to vector<8x32xbf16>
    %cst_15 = arith.constant dense<0.000000e+00> : vector<8x128xf32>
    %18 = tpu.matmul %17, %7, %cst_15 {dimension_numbers = #tpu.dot_dimension_numbers<[1], [0], [0], [1], [0, 0, 1, 1], [], []>} : vector<8x32xbf16>, vector<32x128xbf16>, vector<8x128xf32> -> vector<8x128xf32>
    %19 = arith.addf %16, %18 : vector<8x128xf32>
    %20 = arith.negf %19 : vector<8x128xf32>
    %21 = math.exp %20 : vector<8x128xf32>
    %cst_16 = arith.constant 1.000000e+00 : f32
    %22 = vector.broadcast %cst_16 : f32 to vector<8x128xf32>
    %23 = arith.addf %22, %21 : vector<8x128xf32>
    %24 = arith.divf %22, %23 : vector<8x128xf32>
    %25 = math.tanh %19 : vector<8x128xf32>
    %26 = vector.extract_strided_slice %24 {offsets = [0, 0], sizes = [8, 32], strides = [1, 1]} : vector<8x128xf32> to vector<8x32xf32>
    %27 = vector.extract_strided_slice %24 {offsets = [0, 32], sizes = [8, 32], strides = [1, 1]} : vector<8x128xf32> to vector<8x32xf32>
    %28 = vector.extract_strided_slice %25 {offsets = [0, 64], sizes = [8, 32], strides = [1, 1]} : vector<8x128xf32> to vector<8x32xf32>
    %29 = vector.extract_strided_slice %24 {offsets = [0, 96], sizes = [8, 32], strides = [1, 1]} : vector<8x128xf32> to vector<8x32xf32>
    %30 = arith.mulf %27, %11 : vector<8x32xf32>
    %31 = arith.mulf %26, %28 : vector<8x32xf32>
    %32 = arith.addf %30, %31 : vector<8x32xf32>
    %33 = math.tanh %32 : vector<8x32xf32>
    %34 = arith.mulf %29, %33 : vector<8x32xf32>
    %35 = arith.truncf %34 : vector<8x32xf32> to vector<8x32xbf16>
    %cst_17 = arith.constant dense<0.000000e+00> : vector<8x128xf32>
    %36 = tpu.matmul %35, %8, %cst_17 {dimension_numbers = #tpu.dot_dimension_numbers<[1], [0], [0], [1], [0, 0, 1, 1], [], []>} : vector<8x32xbf16>, vector<32x128xbf16>, vector<8x128xf32> -> vector<8x128xf32>
    %37 = arith.addf %36, %15 : vector<8x128xf32>
    %38 = arith.negf %37 : vector<8x128xf32>
    %39 = math.exp %38 : vector<8x128xf32>
    %cst_18 = arith.constant 1.000000e+00 : f32
    %40 = vector.broadcast %cst_18 : f32 to vector<8x128xf32>
    %41 = arith.addf %40, %39 : vector<8x128xf32>
    %42 = arith.divf %40, %41 : vector<8x128xf32>
    %43 = math.tanh %37 : vector<8x128xf32>
    %44 = vector.extract_strided_slice %42 {offsets = [0, 0], sizes = [8, 32], strides = [1, 1]} : vector<8x128xf32> to vector<8x32xf32>
    %45 = vector.extract_strided_slice %42 {offsets = [0, 32], sizes = [8, 32], strides = [1, 1]} : vector<8x128xf32> to vector<8x32xf32>
    %46 = vector.extract_strided_slice %43 {offsets = [0, 64], sizes = [8, 32], strides = [1, 1]} : vector<8x128xf32> to vector<8x32xf32>
    %47 = vector.extract_strided_slice %42 {offsets = [0, 96], sizes = [8, 32], strides = [1, 1]} : vector<8x128xf32> to vector<8x32xf32>
    %48 = arith.mulf %45, %11 : vector<8x32xf32>
    %49 = arith.mulf %44, %46 : vector<8x32xf32>
    %50 = arith.addf %48, %49 : vector<8x32xf32>
    %51 = math.tanh %50 : vector<8x32xf32>
    %52 = arith.mulf %47, %51 : vector<8x32xf32>
    %53 = arith.truncf %52 : vector<8x32xf32> to vector<8x32xbf16>
    %cst_19 = arith.constant dense<0.000000e+00> : vector<8x128xf32>
    %54 = tpu.matmul %53, %9, %cst_19 {dimension_numbers = #tpu.dot_dimension_numbers<[1], [0], [0], [1], [0, 0, 1, 1], [], []>} : vector<8x32xbf16>, vector<32x128xbf16>, vector<8x128xf32> -> vector<8x128xf32>
    %55 = vector.broadcast %10 : vector<1x128xf32> to vector<8x128xf32>
    %56 = arith.addf %54, %55 : vector<8x128xf32>
    %57 = vector.extract_strided_slice %6 {offsets = [8, 0], sizes = [8, 128], strides = [1, 1]} : vector<64x128xf32> to vector<8x128xf32>
    %58 = arith.truncf %34 : vector<8x32xf32> to vector<8x32xbf16>
    %cst_20 = arith.constant dense<0.000000e+00> : vector<8x128xf32>
    %59 = tpu.matmul %58, %7, %cst_20 {dimension_numbers = #tpu.dot_dimension_numbers<[1], [0], [0], [1], [0, 0, 1, 1], [], []>} : vector<8x32xbf16>, vector<32x128xbf16>, vector<8x128xf32> -> vector<8x128xf32>
    %60 = arith.addf %57, %59 : vector<8x128xf32>
    %61 = arith.negf %60 : vector<8x128xf32>
    %62 = math.exp %61 : vector<8x128xf32>
    %cst_21 = arith.constant 1.000000e+00 : f32
    %63 = vector.broadcast %cst_21 : f32 to vector<8x128xf32>
    %64 = arith.addf %63, %62 : vector<8x128xf32>
    %65 = arith.divf %63, %64 : vector<8x128xf32>
    %66 = math.tanh %60 : vector<8x128xf32>
    %67 = vector.extract_strided_slice %65 {offsets = [0, 0], sizes = [8, 32], strides = [1, 1]} : vector<8x128xf32> to vector<8x32xf32>
    %68 = vector.extract_strided_slice %65 {offsets = [0, 32], sizes = [8, 32], strides = [1, 1]} : vector<8x128xf32> to vector<8x32xf32>
    %69 = vector.extract_strided_slice %66 {offsets = [0, 64], sizes = [8, 32], strides = [1, 1]} : vector<8x128xf32> to vector<8x32xf32>
    %70 = vector.extract_strided_slice %65 {offsets = [0, 96], sizes = [8, 32], strides = [1, 1]} : vector<8x128xf32> to vector<8x32xf32>
    %71 = arith.mulf %68, %32 : vector<8x32xf32>
    %72 = arith.mulf %67, %69 : vector<8x32xf32>
    %73 = arith.addf %71, %72 : vector<8x32xf32>
    %74 = math.tanh %73 : vector<8x32xf32>
    %75 = arith.mulf %70, %74 : vector<8x32xf32>
    %76 = arith.truncf %75 : vector<8x32xf32> to vector<8x32xbf16>
    %cst_22 = arith.constant dense<0.000000e+00> : vector<8x128xf32>
    %77 = tpu.matmul %76, %8, %cst_22 {dimension_numbers = #tpu.dot_dimension_numbers<[1], [0], [0], [1], [0, 0, 1, 1], [], []>} : vector<8x32xbf16>, vector<32x128xbf16>, vector<8x128xf32> -> vector<8x128xf32>
    %78 = arith.addf %77, %56 : vector<8x128xf32>
    %79 = arith.negf %78 : vector<8x128xf32>
    %80 = math.exp %79 : vector<8x128xf32>
    %cst_23 = arith.constant 1.000000e+00 : f32
    %81 = vector.broadcast %cst_23 : f32 to vector<8x128xf32>
    %82 = arith.addf %81, %80 : vector<8x128xf32>
    %83 = arith.divf %81, %82 : vector<8x128xf32>
    %84 = math.tanh %78 : vector<8x128xf32>
    %85 = vector.extract_strided_slice %83 {offsets = [0, 0], sizes = [8, 32], strides = [1, 1]} : vector<8x128xf32> to vector<8x32xf32>
    %86 = vector.extract_strided_slice %83 {offsets = [0, 32], sizes = [8, 32], strides = [1, 1]} : vector<8x128xf32> to vector<8x32xf32>
    %87 = vector.extract_strided_slice %84 {offsets = [0, 64], sizes = [8, 32], strides = [1, 1]} : vector<8x128xf32> to vector<8x32xf32>
    %88 = vector.extract_strided_slice %83 {offsets = [0, 96], sizes = [8, 32], strides = [1, 1]} : vector<8x128xf32> to vector<8x32xf32>
    %89 = arith.mulf %86, %50 : vector<8x32xf32>
    %90 = arith.mulf %85, %87 : vector<8x32xf32>
    %91 = arith.addf %89, %90 : vector<8x32xf32>
    %92 = math.tanh %91 : vector<8x32xf32>
    %93 = arith.mulf %88, %92 : vector<8x32xf32>
    %94 = arith.truncf %93 : vector<8x32xf32> to vector<8x32xbf16>
    %cst_24 = arith.constant dense<0.000000e+00> : vector<8x128xf32>
    %95 = tpu.matmul %94, %9, %cst_24 {dimension_numbers = #tpu.dot_dimension_numbers<[1], [0], [0], [1], [0, 0, 1, 1], [], []>} : vector<8x32xbf16>, vector<32x128xbf16>, vector<8x128xf32> -> vector<8x128xf32>
    %96 = vector.broadcast %10 : vector<1x128xf32> to vector<8x128xf32>
    %97 = arith.addf %95, %96 : vector<8x128xf32>
    %98 = vector.extract_strided_slice %6 {offsets = [16, 0], sizes = [8, 128], strides = [1, 1]} : vector<64x128xf32> to vector<8x128xf32>
    %99 = arith.truncf %75 : vector<8x32xf32> to vector<8x32xbf16>
    %cst_25 = arith.constant dense<0.000000e+00> : vector<8x128xf32>
    %100 = tpu.matmul %99, %7, %cst_25 {dimension_numbers = #tpu.dot_dimension_numbers<[1], [0], [0], [1], [0, 0, 1, 1], [], []>} : vector<8x32xbf16>, vector<32x128xbf16>, vector<8x128xf32> -> vector<8x128xf32>
    %101 = arith.addf %98, %100 : vector<8x128xf32>
    %102 = arith.negf %101 : vector<8x128xf32>
    %103 = math.exp %102 : vector<8x128xf32>
    %cst_26 = arith.constant 1.000000e+00 : f32
    %104 = vector.broadcast %cst_26 : f32 to vector<8x128xf32>
    %105 = arith.addf %104, %103 : vector<8x128xf32>
    %106 = arith.divf %104, %105 : vector<8x128xf32>
    %107 = math.tanh %101 : vector<8x128xf32>
    %108 = vector.extract_strided_slice %106 {offsets = [0, 0], sizes = [8, 32], strides = [1, 1]} : vector<8x128xf32> to vector<8x32xf32>
    %109 = vector.extract_strided_slice %106 {offsets = [0, 32], sizes = [8, 32], strides = [1, 1]} : vector<8x128xf32> to vector<8x32xf32>
    %110 = vector.extract_strided_slice %107 {offsets = [0, 64], sizes = [8, 32], strides = [1, 1]} : vector<8x128xf32> to vector<8x32xf32>
    %111 = vector.extract_strided_slice %106 {offsets = [0, 96], sizes = [8, 32], strides = [1, 1]} : vector<8x128xf32> to vector<8x32xf32>
    %112 = arith.mulf %109, %73 : vector<8x32xf32>
    %113 = arith.mulf %108, %110 : vector<8x32xf32>
    %114 = arith.addf %112, %113 : vector<8x32xf32>
    %115 = math.tanh %114 : vector<8x32xf32>
    %116 = arith.mulf %111, %115 : vector<8x32xf32>
    %117 = arith.truncf %116 : vector<8x32xf32> to vector<8x32xbf16>
    %cst_27 = arith.constant dense<0.000000e+00> : vector<8x128xf32>
    %118 = tpu.matmul %117, %8, %cst_27 {dimension_numbers = #tpu.dot_dimension_numbers<[1], [0], [0], [1], [0, 0, 1, 1], [], []>} : vector<8x32xbf16>, vector<32x128xbf16>, vector<8x128xf32> -> vector<8x128xf32>
    %119 = arith.addf %118, %97 : vector<8x128xf32>
    %120 = arith.negf %119 : vector<8x128xf32>
    %121 = math.exp %120 : vector<8x128xf32>
    %cst_28 = arith.constant 1.000000e+00 : f32
    %122 = vector.broadcast %cst_28 : f32 to vector<8x128xf32>
    %123 = arith.addf %122, %121 : vector<8x128xf32>
    %124 = arith.divf %122, %123 : vector<8x128xf32>
    %125 = math.tanh %119 : vector<8x128xf32>
    %126 = vector.extract_strided_slice %124 {offsets = [0, 0], sizes = [8, 32], strides = [1, 1]} : vector<8x128xf32> to vector<8x32xf32>
    %127 = vector.extract_strided_slice %124 {offsets = [0, 32], sizes = [8, 32], strides = [1, 1]} : vector<8x128xf32> to vector<8x32xf32>
    %128 = vector.extract_strided_slice %125 {offsets = [0, 64], sizes = [8, 32], strides = [1, 1]} : vector<8x128xf32> to vector<8x32xf32>
    %129 = vector.extract_strided_slice %124 {offsets = [0, 96], sizes = [8, 32], strides = [1, 1]} : vector<8x128xf32> to vector<8x32xf32>
    %130 = arith.mulf %127, %91 : vector<8x32xf32>
    %131 = arith.mulf %126, %128 : vector<8x32xf32>
    %132 = arith.addf %130, %131 : vector<8x32xf32>
    %133 = math.tanh %132 : vector<8x32xf32>
    %134 = arith.mulf %129, %133 : vector<8x32xf32>
    %135 = arith.truncf %134 : vector<8x32xf32> to vector<8x32xbf16>
    %cst_29 = arith.constant dense<0.000000e+00> : vector<8x128xf32>
    %136 = tpu.matmul %135, %9, %cst_29 {dimension_numbers = #tpu.dot_dimension_numbers<[1], [0], [0], [1], [0, 0, 1, 1], [], []>} : vector<8x32xbf16>, vector<32x128xbf16>, vector<8x128xf32> -> vector<8x128xf32>
    %137 = vector.broadcast %10 : vector<1x128xf32> to vector<8x128xf32>
    %138 = arith.addf %136, %137 : vector<8x128xf32>
    %139 = vector.extract_strided_slice %6 {offsets = [24, 0], sizes = [8, 128], strides = [1, 1]} : vector<64x128xf32> to vector<8x128xf32>
    %140 = arith.truncf %116 : vector<8x32xf32> to vector<8x32xbf16>
    %cst_30 = arith.constant dense<0.000000e+00> : vector<8x128xf32>
    %141 = tpu.matmul %140, %7, %cst_30 {dimension_numbers = #tpu.dot_dimension_numbers<[1], [0], [0], [1], [0, 0, 1, 1], [], []>} : vector<8x32xbf16>, vector<32x128xbf16>, vector<8x128xf32> -> vector<8x128xf32>
    %142 = arith.addf %139, %141 : vector<8x128xf32>
    %143 = arith.negf %142 : vector<8x128xf32>
    %144 = math.exp %143 : vector<8x128xf32>
    %cst_31 = arith.constant 1.000000e+00 : f32
    %145 = vector.broadcast %cst_31 : f32 to vector<8x128xf32>
    %146 = arith.addf %145, %144 : vector<8x128xf32>
    %147 = arith.divf %145, %146 : vector<8x128xf32>
    %148 = math.tanh %142 : vector<8x128xf32>
    %149 = vector.extract_strided_slice %147 {offsets = [0, 0], sizes = [8, 32], strides = [1, 1]} : vector<8x128xf32> to vector<8x32xf32>
    %150 = vector.extract_strided_slice %147 {offsets = [0, 32], sizes = [8, 32], strides = [1, 1]} : vector<8x128xf32> to vector<8x32xf32>
    %151 = vector.extract_strided_slice %148 {offsets = [0, 64], sizes = [8, 32], strides = [1, 1]} : vector<8x128xf32> to vector<8x32xf32>
    %152 = vector.extract_strided_slice %147 {offsets = [0, 96], sizes = [8, 32], strides = [1, 1]} : vector<8x128xf32> to vector<8x32xf32>
    %153 = arith.mulf %150, %114 : vector<8x32xf32>
    %154 = arith.mulf %149, %151 : vector<8x32xf32>
    %155 = arith.addf %153, %154 : vector<8x32xf32>
    %156 = math.tanh %155 : vector<8x32xf32>
    %157 = arith.mulf %152, %156 : vector<8x32xf32>
    %158 = arith.truncf %157 : vector<8x32xf32> to vector<8x32xbf16>
    %cst_32 = arith.constant dense<0.000000e+00> : vector<8x128xf32>
    %159 = tpu.matmul %158, %8, %cst_32 {dimension_numbers = #tpu.dot_dimension_numbers<[1], [0], [0], [1], [0, 0, 1, 1], [], []>} : vector<8x32xbf16>, vector<32x128xbf16>, vector<8x128xf32> -> vector<8x128xf32>
    %160 = arith.addf %159, %138 : vector<8x128xf32>
    %161 = arith.negf %160 : vector<8x128xf32>
    %162 = math.exp %161 : vector<8x128xf32>
    %cst_33 = arith.constant 1.000000e+00 : f32
    %163 = vector.broadcast %cst_33 : f32 to vector<8x128xf32>
    %164 = arith.addf %163, %162 : vector<8x128xf32>
    %165 = arith.divf %163, %164 : vector<8x128xf32>
    %166 = math.tanh %160 : vector<8x128xf32>
    %167 = vector.extract_strided_slice %165 {offsets = [0, 0], sizes = [8, 32], strides = [1, 1]} : vector<8x128xf32> to vector<8x32xf32>
    %168 = vector.extract_strided_slice %165 {offsets = [0, 32], sizes = [8, 32], strides = [1, 1]} : vector<8x128xf32> to vector<8x32xf32>
    %169 = vector.extract_strided_slice %166 {offsets = [0, 64], sizes = [8, 32], strides = [1, 1]} : vector<8x128xf32> to vector<8x32xf32>
    %170 = vector.extract_strided_slice %165 {offsets = [0, 96], sizes = [8, 32], strides = [1, 1]} : vector<8x128xf32> to vector<8x32xf32>
    %171 = arith.mulf %168, %132 : vector<8x32xf32>
    %172 = arith.mulf %167, %169 : vector<8x32xf32>
    %173 = arith.addf %171, %172 : vector<8x32xf32>
    %174 = math.tanh %173 : vector<8x32xf32>
    %175 = arith.mulf %170, %174 : vector<8x32xf32>
    %176 = arith.truncf %175 : vector<8x32xf32> to vector<8x32xbf16>
    %cst_34 = arith.constant dense<0.000000e+00> : vector<8x128xf32>
    %177 = tpu.matmul %176, %9, %cst_34 {dimension_numbers = #tpu.dot_dimension_numbers<[1], [0], [0], [1], [0, 0, 1, 1], [], []>} : vector<8x32xbf16>, vector<32x128xbf16>, vector<8x128xf32> -> vector<8x128xf32>
    %178 = vector.broadcast %10 : vector<1x128xf32> to vector<8x128xf32>
    %179 = arith.addf %177, %178 : vector<8x128xf32>
    %180 = vector.extract_strided_slice %6 {offsets = [32, 0], sizes = [8, 128], strides = [1, 1]} : vector<64x128xf32> to vector<8x128xf32>
    %181 = arith.truncf %157 : vector<8x32xf32> to vector<8x32xbf16>
    %cst_35 = arith.constant dense<0.000000e+00> : vector<8x128xf32>
    %182 = tpu.matmul %181, %7, %cst_35 {dimension_numbers = #tpu.dot_dimension_numbers<[1], [0], [0], [1], [0, 0, 1, 1], [], []>} : vector<8x32xbf16>, vector<32x128xbf16>, vector<8x128xf32> -> vector<8x128xf32>
    %183 = arith.addf %180, %182 : vector<8x128xf32>
    %184 = arith.negf %183 : vector<8x128xf32>
    %185 = math.exp %184 : vector<8x128xf32>
    %cst_36 = arith.constant 1.000000e+00 : f32
    %186 = vector.broadcast %cst_36 : f32 to vector<8x128xf32>
    %187 = arith.addf %186, %185 : vector<8x128xf32>
    %188 = arith.divf %186, %187 : vector<8x128xf32>
    %189 = math.tanh %183 : vector<8x128xf32>
    %190 = vector.extract_strided_slice %188 {offsets = [0, 0], sizes = [8, 32], strides = [1, 1]} : vector<8x128xf32> to vector<8x32xf32>
    %191 = vector.extract_strided_slice %188 {offsets = [0, 32], sizes = [8, 32], strides = [1, 1]} : vector<8x128xf32> to vector<8x32xf32>
    %192 = vector.extract_strided_slice %189 {offsets = [0, 64], sizes = [8, 32], strides = [1, 1]} : vector<8x128xf32> to vector<8x32xf32>
    %193 = vector.extract_strided_slice %188 {offsets = [0, 96], sizes = [8, 32], strides = [1, 1]} : vector<8x128xf32> to vector<8x32xf32>
    %194 = arith.mulf %191, %155 : vector<8x32xf32>
    %195 = arith.mulf %190, %192 : vector<8x32xf32>
    %196 = arith.addf %194, %195 : vector<8x32xf32>
    %197 = math.tanh %196 : vector<8x32xf32>
    %198 = arith.mulf %193, %197 : vector<8x32xf32>
    %199 = arith.truncf %198 : vector<8x32xf32> to vector<8x32xbf16>
    %cst_37 = arith.constant dense<0.000000e+00> : vector<8x128xf32>
    %200 = tpu.matmul %199, %8, %cst_37 {dimension_numbers = #tpu.dot_dimension_numbers<[1], [0], [0], [1], [0, 0, 1, 1], [], []>} : vector<8x32xbf16>, vector<32x128xbf16>, vector<8x128xf32> -> vector<8x128xf32>
    %201 = arith.addf %200, %179 : vector<8x128xf32>
    %202 = arith.negf %201 : vector<8x128xf32>
    %203 = math.exp %202 : vector<8x128xf32>
    %cst_38 = arith.constant 1.000000e+00 : f32
    %204 = vector.broadcast %cst_38 : f32 to vector<8x128xf32>
    %205 = arith.addf %204, %203 : vector<8x128xf32>
    %206 = arith.divf %204, %205 : vector<8x128xf32>
    %207 = math.tanh %201 : vector<8x128xf32>
    %208 = vector.extract_strided_slice %206 {offsets = [0, 0], sizes = [8, 32], strides = [1, 1]} : vector<8x128xf32> to vector<8x32xf32>
    %209 = vector.extract_strided_slice %206 {offsets = [0, 32], sizes = [8, 32], strides = [1, 1]} : vector<8x128xf32> to vector<8x32xf32>
    %210 = vector.extract_strided_slice %207 {offsets = [0, 64], sizes = [8, 32], strides = [1, 1]} : vector<8x128xf32> to vector<8x32xf32>
    %211 = vector.extract_strided_slice %206 {offsets = [0, 96], sizes = [8, 32], strides = [1, 1]} : vector<8x128xf32> to vector<8x32xf32>
    %212 = arith.mulf %209, %173 : vector<8x32xf32>
    %213 = arith.mulf %208, %210 : vector<8x32xf32>
    %214 = arith.addf %212, %213 : vector<8x32xf32>
    %215 = math.tanh %214 : vector<8x32xf32>
    %216 = arith.mulf %211, %215 : vector<8x32xf32>
    %217 = arith.truncf %216 : vector<8x32xf32> to vector<8x32xbf16>
    %cst_39 = arith.constant dense<0.000000e+00> : vector<8x128xf32>
    %218 = tpu.matmul %217, %9, %cst_39 {dimension_numbers = #tpu.dot_dimension_numbers<[1], [0], [0], [1], [0, 0, 1, 1], [], []>} : vector<8x32xbf16>, vector<32x128xbf16>, vector<8x128xf32> -> vector<8x128xf32>
    %219 = vector.broadcast %10 : vector<1x128xf32> to vector<8x128xf32>
    %220 = arith.addf %218, %219 : vector<8x128xf32>
    %221 = vector.extract_strided_slice %6 {offsets = [40, 0], sizes = [8, 128], strides = [1, 1]} : vector<64x128xf32> to vector<8x128xf32>
    %222 = arith.truncf %198 : vector<8x32xf32> to vector<8x32xbf16>
    %cst_40 = arith.constant dense<0.000000e+00> : vector<8x128xf32>
    %223 = tpu.matmul %222, %7, %cst_40 {dimension_numbers = #tpu.dot_dimension_numbers<[1], [0], [0], [1], [0, 0, 1, 1], [], []>} : vector<8x32xbf16>, vector<32x128xbf16>, vector<8x128xf32> -> vector<8x128xf32>
    %224 = arith.addf %221, %223 : vector<8x128xf32>
    %225 = arith.negf %224 : vector<8x128xf32>
    %226 = math.exp %225 : vector<8x128xf32>
    %cst_41 = arith.constant 1.000000e+00 : f32
    %227 = vector.broadcast %cst_41 : f32 to vector<8x128xf32>
    %228 = arith.addf %227, %226 : vector<8x128xf32>
    %229 = arith.divf %227, %228 : vector<8x128xf32>
    %230 = math.tanh %224 : vector<8x128xf32>
    %231 = vector.extract_strided_slice %229 {offsets = [0, 0], sizes = [8, 32], strides = [1, 1]} : vector<8x128xf32> to vector<8x32xf32>
    %232 = vector.extract_strided_slice %229 {offsets = [0, 32], sizes = [8, 32], strides = [1, 1]} : vector<8x128xf32> to vector<8x32xf32>
    %233 = vector.extract_strided_slice %230 {offsets = [0, 64], sizes = [8, 32], strides = [1, 1]} : vector<8x128xf32> to vector<8x32xf32>
    %234 = vector.extract_strided_slice %229 {offsets = [0, 96], sizes = [8, 32], strides = [1, 1]} : vector<8x128xf32> to vector<8x32xf32>
    %235 = arith.mulf %232, %196 : vector<8x32xf32>
    %236 = arith.mulf %231, %233 : vector<8x32xf32>
    %237 = arith.addf %235, %236 : vector<8x32xf32>
    %238 = math.tanh %237 : vector<8x32xf32>
    %239 = arith.mulf %234, %238 : vector<8x32xf32>
    %240 = arith.truncf %239 : vector<8x32xf32> to vector<8x32xbf16>
    %cst_42 = arith.constant dense<0.000000e+00> : vector<8x128xf32>
    %241 = tpu.matmul %240, %8, %cst_42 {dimension_numbers = #tpu.dot_dimension_numbers<[1], [0], [0], [1], [0, 0, 1, 1], [], []>} : vector<8x32xbf16>, vector<32x128xbf16>, vector<8x128xf32> -> vector<8x128xf32>
    %242 = arith.addf %241, %220 : vector<8x128xf32>
    %243 = arith.negf %242 : vector<8x128xf32>
    %244 = math.exp %243 : vector<8x128xf32>
    %cst_43 = arith.constant 1.000000e+00 : f32
    %245 = vector.broadcast %cst_43 : f32 to vector<8x128xf32>
    %246 = arith.addf %245, %244 : vector<8x128xf32>
    %247 = arith.divf %245, %246 : vector<8x128xf32>
    %248 = math.tanh %242 : vector<8x128xf32>
    %249 = vector.extract_strided_slice %247 {offsets = [0, 0], sizes = [8, 32], strides = [1, 1]} : vector<8x128xf32> to vector<8x32xf32>
    %250 = vector.extract_strided_slice %247 {offsets = [0, 32], sizes = [8, 32], strides = [1, 1]} : vector<8x128xf32> to vector<8x32xf32>
    %251 = vector.extract_strided_slice %248 {offsets = [0, 64], sizes = [8, 32], strides = [1, 1]} : vector<8x128xf32> to vector<8x32xf32>
    %252 = vector.extract_strided_slice %247 {offsets = [0, 96], sizes = [8, 32], strides = [1, 1]} : vector<8x128xf32> to vector<8x32xf32>
    %253 = arith.mulf %250, %214 : vector<8x32xf32>
    %254 = arith.mulf %249, %251 : vector<8x32xf32>
    %255 = arith.addf %253, %254 : vector<8x32xf32>
    %256 = math.tanh %255 : vector<8x32xf32>
    %257 = arith.mulf %252, %256 : vector<8x32xf32>
    %258 = arith.truncf %257 : vector<8x32xf32> to vector<8x32xbf16>
    %cst_44 = arith.constant dense<0.000000e+00> : vector<8x128xf32>
    %259 = tpu.matmul %258, %9, %cst_44 {dimension_numbers = #tpu.dot_dimension_numbers<[1], [0], [0], [1], [0, 0, 1, 1], [], []>} : vector<8x32xbf16>, vector<32x128xbf16>, vector<8x128xf32> -> vector<8x128xf32>
    %260 = vector.broadcast %10 : vector<1x128xf32> to vector<8x128xf32>
    %261 = arith.addf %259, %260 : vector<8x128xf32>
    %262 = vector.extract_strided_slice %6 {offsets = [48, 0], sizes = [8, 128], strides = [1, 1]} : vector<64x128xf32> to vector<8x128xf32>
    %263 = arith.truncf %239 : vector<8x32xf32> to vector<8x32xbf16>
    %cst_45 = arith.constant dense<0.000000e+00> : vector<8x128xf32>
    %264 = tpu.matmul %263, %7, %cst_45 {dimension_numbers = #tpu.dot_dimension_numbers<[1], [0], [0], [1], [0, 0, 1, 1], [], []>} : vector<8x32xbf16>, vector<32x128xbf16>, vector<8x128xf32> -> vector<8x128xf32>
    %265 = arith.addf %262, %264 : vector<8x128xf32>
    %266 = arith.negf %265 : vector<8x128xf32>
    %267 = math.exp %266 : vector<8x128xf32>
    %cst_46 = arith.constant 1.000000e+00 : f32
    %268 = vector.broadcast %cst_46 : f32 to vector<8x128xf32>
    %269 = arith.addf %268, %267 : vector<8x128xf32>
    %270 = arith.divf %268, %269 : vector<8x128xf32>
    %271 = math.tanh %265 : vector<8x128xf32>
    %272 = vector.extract_strided_slice %270 {offsets = [0, 0], sizes = [8, 32], strides = [1, 1]} : vector<8x128xf32> to vector<8x32xf32>
    %273 = vector.extract_strided_slice %270 {offsets = [0, 32], sizes = [8, 32], strides = [1, 1]} : vector<8x128xf32> to vector<8x32xf32>
    %274 = vector.extract_strided_slice %271 {offsets = [0, 64], sizes = [8, 32], strides = [1, 1]} : vector<8x128xf32> to vector<8x32xf32>
    %275 = vector.extract_strided_slice %270 {offsets = [0, 96], sizes = [8, 32], strides = [1, 1]} : vector<8x128xf32> to vector<8x32xf32>
    %276 = arith.mulf %273, %237 : vector<8x32xf32>
    %277 = arith.mulf %272, %274 : vector<8x32xf32>
    %278 = arith.addf %276, %277 : vector<8x32xf32>
    %279 = math.tanh %278 : vector<8x32xf32>
    %280 = arith.mulf %275, %279 : vector<8x32xf32>
    %281 = arith.truncf %280 : vector<8x32xf32> to vector<8x32xbf16>
    %cst_47 = arith.constant dense<0.000000e+00> : vector<8x128xf32>
    %282 = tpu.matmul %281, %8, %cst_47 {dimension_numbers = #tpu.dot_dimension_numbers<[1], [0], [0], [1], [0, 0, 1, 1], [], []>} : vector<8x32xbf16>, vector<32x128xbf16>, vector<8x128xf32> -> vector<8x128xf32>
    %283 = arith.addf %282, %261 : vector<8x128xf32>
    %284 = arith.negf %283 : vector<8x128xf32>
    %285 = math.exp %284 : vector<8x128xf32>
    %cst_48 = arith.constant 1.000000e+00 : f32
    %286 = vector.broadcast %cst_48 : f32 to vector<8x128xf32>
    %287 = arith.addf %286, %285 : vector<8x128xf32>
    %288 = arith.divf %286, %287 : vector<8x128xf32>
    %289 = math.tanh %283 : vector<8x128xf32>
    %290 = vector.extract_strided_slice %288 {offsets = [0, 0], sizes = [8, 32], strides = [1, 1]} : vector<8x128xf32> to vector<8x32xf32>
    %291 = vector.extract_strided_slice %288 {offsets = [0, 32], sizes = [8, 32], strides = [1, 1]} : vector<8x128xf32> to vector<8x32xf32>
    %292 = vector.extract_strided_slice %289 {offsets = [0, 64], sizes = [8, 32], strides = [1, 1]} : vector<8x128xf32> to vector<8x32xf32>
    %293 = vector.extract_strided_slice %288 {offsets = [0, 96], sizes = [8, 32], strides = [1, 1]} : vector<8x128xf32> to vector<8x32xf32>
    %294 = arith.mulf %291, %255 : vector<8x32xf32>
    %295 = arith.mulf %290, %292 : vector<8x32xf32>
    %296 = arith.addf %294, %295 : vector<8x32xf32>
    %297 = math.tanh %296 : vector<8x32xf32>
    %298 = arith.mulf %293, %297 : vector<8x32xf32>
    %299 = arith.truncf %298 : vector<8x32xf32> to vector<8x32xbf16>
    %cst_49 = arith.constant dense<0.000000e+00> : vector<8x128xf32>
    %300 = tpu.matmul %299, %9, %cst_49 {dimension_numbers = #tpu.dot_dimension_numbers<[1], [0], [0], [1], [0, 0, 1, 1], [], []>} : vector<8x32xbf16>, vector<32x128xbf16>, vector<8x128xf32> -> vector<8x128xf32>
    %301 = vector.broadcast %10 : vector<1x128xf32> to vector<8x128xf32>
    %302 = arith.addf %300, %301 : vector<8x128xf32>
    %303 = vector.extract_strided_slice %6 {offsets = [56, 0], sizes = [8, 128], strides = [1, 1]} : vector<64x128xf32> to vector<8x128xf32>
    %304 = arith.truncf %280 : vector<8x32xf32> to vector<8x32xbf16>
    %cst_50 = arith.constant dense<0.000000e+00> : vector<8x128xf32>
    %305 = tpu.matmul %304, %7, %cst_50 {dimension_numbers = #tpu.dot_dimension_numbers<[1], [0], [0], [1], [0, 0, 1, 1], [], []>} : vector<8x32xbf16>, vector<32x128xbf16>, vector<8x128xf32> -> vector<8x128xf32>
    %306 = arith.addf %303, %305 : vector<8x128xf32>
    %307 = arith.negf %306 : vector<8x128xf32>
    %308 = math.exp %307 : vector<8x128xf32>
    %cst_51 = arith.constant 1.000000e+00 : f32
    %309 = vector.broadcast %cst_51 : f32 to vector<8x128xf32>
    %310 = arith.addf %309, %308 : vector<8x128xf32>
    %311 = arith.divf %309, %310 : vector<8x128xf32>
    %312 = math.tanh %306 : vector<8x128xf32>
    %313 = vector.extract_strided_slice %311 {offsets = [0, 0], sizes = [8, 32], strides = [1, 1]} : vector<8x128xf32> to vector<8x32xf32>
    %314 = vector.extract_strided_slice %311 {offsets = [0, 32], sizes = [8, 32], strides = [1, 1]} : vector<8x128xf32> to vector<8x32xf32>
    %315 = vector.extract_strided_slice %312 {offsets = [0, 64], sizes = [8, 32], strides = [1, 1]} : vector<8x128xf32> to vector<8x32xf32>
    %316 = vector.extract_strided_slice %311 {offsets = [0, 96], sizes = [8, 32], strides = [1, 1]} : vector<8x128xf32> to vector<8x32xf32>
    %317 = arith.mulf %314, %278 : vector<8x32xf32>
    %318 = arith.mulf %313, %315 : vector<8x32xf32>
    %319 = arith.addf %317, %318 : vector<8x32xf32>
    %320 = math.tanh %319 : vector<8x32xf32>
    %321 = arith.mulf %316, %320 : vector<8x32xf32>
    %322 = arith.truncf %321 : vector<8x32xf32> to vector<8x32xbf16>
    %cst_52 = arith.constant dense<0.000000e+00> : vector<8x128xf32>
    %323 = tpu.matmul %322, %8, %cst_52 {dimension_numbers = #tpu.dot_dimension_numbers<[1], [0], [0], [1], [0, 0, 1, 1], [], []>} : vector<8x32xbf16>, vector<32x128xbf16>, vector<8x128xf32> -> vector<8x128xf32>
    %324 = arith.addf %323, %302 : vector<8x128xf32>
    %325 = arith.negf %324 : vector<8x128xf32>
    %326 = math.exp %325 : vector<8x128xf32>
    %cst_53 = arith.constant 1.000000e+00 : f32
    %327 = vector.broadcast %cst_53 : f32 to vector<8x128xf32>
    %328 = arith.addf %327, %326 : vector<8x128xf32>
    %329 = arith.divf %327, %328 : vector<8x128xf32>
    %330 = math.tanh %324 : vector<8x128xf32>
    %331 = vector.extract_strided_slice %329 {offsets = [0, 0], sizes = [8, 32], strides = [1, 1]} : vector<8x128xf32> to vector<8x32xf32>
    %332 = vector.extract_strided_slice %329 {offsets = [0, 32], sizes = [8, 32], strides = [1, 1]} : vector<8x128xf32> to vector<8x32xf32>
    %333 = vector.extract_strided_slice %330 {offsets = [0, 64], sizes = [8, 32], strides = [1, 1]} : vector<8x128xf32> to vector<8x32xf32>
    %334 = vector.extract_strided_slice %329 {offsets = [0, 96], sizes = [8, 32], strides = [1, 1]} : vector<8x128xf32> to vector<8x32xf32>
    %335 = arith.mulf %332, %296 : vector<8x32xf32>
    %336 = arith.mulf %331, %333 : vector<8x32xf32>
    %337 = arith.addf %335, %336 : vector<8x32xf32>
    %338 = math.tanh %337 : vector<8x32xf32>
    %339 = arith.mulf %334, %338 : vector<8x32xf32>
    %340 = tpu.concatenate %52, %93, %134, %175, %216, %257, %298, %339 in 0 : vector<8x32xf32>, vector<8x32xf32>, vector<8x32xf32>, vector<8x32xf32>, vector<8x32xf32>, vector<8x32xf32>, vector<8x32xf32>, vector<8x32xf32> -> vector<64x32xf32>
    %341 = arith.truncf %340 : vector<64x32xf32> to vector<64x32xbf16>
    %c0_54 = arith.constant 0 : index
    %c0_55 = arith.constant 0 : index
    %342 = vector.load %arg7[%c0_54, %c0_55] : memref<32x128xbf16, #tpu.memory_space<vmem>>, vector<32x128xbf16>
    %cst_56 = arith.constant dense<0.000000e+00> : vector<64x128xf32>
    %343 = tpu.matmul %341, %342, %cst_56 {dimension_numbers = #tpu.dot_dimension_numbers<[1], [0], [0], [1], [0, 0, 1, 1], [], []>} : vector<64x32xbf16>, vector<32x128xbf16>, vector<64x128xf32> -> vector<64x128xf32>
    %c0_57 = arith.constant 0 : index
    %c0_58 = arith.constant 0 : index
    %344 = vector.load %arg8[%c0_57, %c0_58] : memref<1x128xf32, #tpu.memory_space<vmem>>, vector<1x128xf32>
    %345 = vector.broadcast %344 : vector<1x128xf32> to vector<64x128xf32>
    %346 = arith.addf %343, %345 : vector<64x128xf32>
    %c0_59 = arith.constant 0 : index
    %c0_60 = arith.constant 0 : index
    %347 = vector.load %arg9[%c0_59, %c0_60] : memref<64x128xf32, #tpu.memory_space<vmem>>, vector<64x128xf32>
    tpu.vector_store %arg9[%c0_59, %c0_60], %346 {strides = array<i32>} : memref<64x128xf32, #tpu.memory_space<vmem>>, vector<64x128xf32>,
    return
  }
}

</mosaic_0001>

<bundles_post_ra>
// kernel: tpu_custom_call.1
= control target key start
LH: loop header
LB: loop body
LE: loop exit
PB: predicated region body
PF: predicated region fallthrough
CT: control target
= control target key end

     0   :  { %vm67_vm0 = vcmask 1041408   ;;  %vm54_vm1 = vcmask 31744   ;;  %v2321_v9 = vmov 0.0   ;;  %vm2322_vm2 = vmmov 0   ;;  %s2830_s0 = inlined_call_operand.vmem [shape: f32[64,4], index: 0, kind: input, shape index: {}]   ;;  %s2831_s1 = inlined_call_operand.vmem [shape: bf16[4,128], index: 1, kind: input, shape index: {}]   ;;  %s2832_s2 = inlined_call_operand.vmem [shape: bf16[32,128], index: 2, kind: input, shape index: {}]   ;;  %s2833_s3 = inlined_call_operand.vmem [shape: f32[1,128], index: 3, kind: input, shape index: {}]   ;;  %s2834_s4 = inlined_call_operand.vmem [shape: bf16[32,128], index: 4, kind: input, shape index: {}]   ;;  %s2835_s5 = inlined_call_operand.vmem [shape: bf16[32,128], index: 5, kind: input, shape index: {}]   ;;  %s2836_s6 = inlined_call_operand.vmem [shape: f32[1,128], index: 6, kind: input, shape index: {}]   ;;  %s2837_s7 = inlined_call_operand.vmem [shape: bf16[32,128], index: 7, kind: input, shape index: {}]   ;;  %s2838_s8 = inlined_call_operand.vmem [shape: f32[1,128], index: 8, kind: input, shape index: {}]   ;;  %s2839_s9 = inlined_call_operand.hbm [shape: f32[64,128], index: 9, kind: output, shape index: {}]  }
   0x1   :  { %v46_v0 = vld [vmem:[%s2831_s1] sm:$0x3]  ;;  %v39_v2 = vld [vmem:[%s2830_s0 + $0x28] sm:$0xff]  ;;  %v40_v5 = vld [vmem:[%s2830_s0 + $0x30] sm:$0xff] }
   0x2   :  { %v38_v1 = vld [vmem:[%s2830_s0 + $0x20] sm:$0xff]  ;;  %2149 = vmatprep.subr.msk.bf16.mxu1 %vm67_vm0, %v46_v0  ;;  %v69_v3 = vsel %vm67_vm0, %v46_v0, 0  ;;  %v41_v6 = vld [vmem:[%s2830_s0 + $0x38] sm:$0xff]  ;;  %2148 = vmatprep.subr.msk.bf16.mxu0 %vm67_vm0, %v46_v0  ;;  %v2397_v8 = vld [vmem:[%s2835_s5 + $0x8] sm:$0xff]  }
   0x3   :  { %v44_v4 = vpack.c.bf16 %v39_v2, %v38_v1  ;;  %2147 = vmatpush3.bf16.msra.mxu1 %v69_v3  ;;  %v45_v7 = vpack.c.bf16 %v41_v6, %v40_v5  ;;  %1933 = vmatpush3.bf16.msra.mxu0 %v69_v3  ;;  %v34_v10 = vld [vmem:[%s2830_s0] sm:$0xff]  ;;  %v35_v11 = vld [vmem:[%s2830_s0 + $0x8] sm:$0xff]  ;;  %v36_v12 = vld [vmem:[%s2830_s0 + $0x10] sm:$0xff] }
   0x4   :  { %1942 = vmatprep.subr.bf16.mxu1 %v2321_v9  ;;  %v37_v13 = vld [vmem:[%s2830_s0 + $0x18] sm:$0xff]  ;;  %1958 = vmatprep.subr.bf16.mxu0 %v2321_v9  ;;  %v42_v14 = vpack.c.bf16 %v35_v11, %v34_v10  ;;  %v2419_v16 = vld [vmem:[%s2835_s5] sm:$0xff]   ;;  %v2432_v17 = vld [vmem:[%s2832_s2 + $0x8] sm:$0xff]  }
   0x5   :  { %1938 = vmatprep.mubr.msk.bf16.mxu1 %vm54_vm1, %v44_v4  ;;  %v43_v15 = vpack.c.bf16 %v37_v13, %v36_v12 }
   0x6   :  { %1939 = vmatmul.mubr.msk.bf16.vlgmr.msra.gmra.mxu1 %vm54_vm1, %v45_v7  ;;  %1934 = vmatprep.mubr.msk.bf16.mxu0 %vm54_vm1, %v42_v14 }
   0x7   :  { %1943 = vmatpush3.bf16.msra.mxu1 %v2397_v8  ;;  %1946 = vmatprep.mubr.msk.bf16.mxu1 %vm2322_vm2, %v2321_v9 }
   0x8   :  { %1944 = vmatprep.subr.bf16.mxu1 %v2321_v9  ;;  %1935 = vmatmul.mubr.msk.bf16.vlgmr.msra.gmra.mxu0 %vm54_vm1, %v43_v15 }
   0x9   :  { %1962 = vmatprep.mubr.msk.bf16.mxu0 %vm2322_vm2, %v2321_v9 }
   0xb   :  { %1945 = vmatpush3.bf16.msra.mxu1 %v2419_v16 }
   0xc   :  { %14 = vsyncpa [#allocation3], 0  ;;  %1950 = vmatprep.subr.bf16.mxu1 %v2321_v9  ;;  %v2323_v18 = vmov 0   ;;  %v2439_v19 = vld [vmem:[%s2832_s2] sm:$0xff]   ;;  %s2325_s13 = smov 32   ;;  %v2484_v54 = vld [vmem:[%s2834_s4 + $0x8] sm:$0xff]  }
   0xd   :  { %v2455_v20 = vld [vmem:[%s2833_s3] ss:$0 sm:$0xff]  ;;  %s2324_s3 = smov 64   ;;  %1959 = vmatpush3.bf16.msra.mxu0 %v2484_v54  ;;  %vm167_vm3 = vcmask 261120   ;;  %s2326_s30 = smov [#allocation2]  }
   0xe   :  { %1947 = vmatmul.mubr.bf16.vlgmr.msra.gmra.mxu1 %v2323_v18  ;;  %v2490_v55 = vld [vmem:[%s2834_s4] sm:$0xff]   ;;  %1960 = vmatprep.subr.bf16.mxu0 %v2321_v9  ;;  %s1781_s5 = sshll.u32 %s2326_s30, 4  ;;  %s1782_s5 = int_to_ptr.vmem [resolvable:$true] %s1781_s5 }
   0xf   :  { %1951 = vmatpush3.bf16.msra.mxu1 %v2432_v17  ;;  %1954 = vmatprep.mubr.msk.bf16.mxu1 %vm2322_vm2, %v2321_v9  ;;  %v2514_v61 = vld [vmem:[%s2836_s6] ss:$0 sm:$0xff]  ;;  %p2304_p1 = scmp.lt.s32.totalorder %s1782_s5, %s1782_s5 }
  0x10   :  { %1952 = vmatprep.subr.bf16.mxu1 %v2321_v9 }
  0x11   :  { %1961 = vmatpush3.bf16.msra.mxu0 %v2490_v55 }
  0x12   :  { %1974 = vmatprep.subr.bf16.mxu0 %v2321_v9 }
  0x13   :  { %1953 = vmatpush3.bf16.msra.mxu1 %v2439_v19 }
  0x14   :  { %1966 = vmatprep.subr.bf16.mxu1 %v2321_v9 }
  0x16   :  { %1955 = vmatmul.mubr.bf16.vlgmr.msra.gmra.mxu1 %v2323_v18 }
  0x17   :  { %1967 = vmatpush3.bf16.msra.mxu1 %v2397_v8  ;;  %1970 = vmatprep.mubr.msk.bf16.mxu1 %vm2322_vm2, %v2321_v9 }
  0x18   :  { %1968 = vmatprep.subr.bf16.mxu1 %v2321_v9 }
  0x1b   :  { %1969 = vmatpush3.bf16.msra.mxu1 %v2419_v16 }
  0x1c   :  { %1982 = vmatprep.subr.bf16.mxu1 %v2321_v9 }
  0xc6   :  { %v1940_v21 = vpop.f32.mrf.mxu1 }
  0xc7   :  { %v2458_v22 = vadd.f32 %v1940_v21, %v2455_v20 }
  0xc8   :  { %v121_v23 = vpop.f32.mrf.mxu1  ;;  %v1936_v25 = vpop.f32.mrf.mxu0 }
  0xc9   :  { %v2461_v24 = vadd.f32 %v2455_v20, %v121_v23  ;;  %v2464_v27 = vadd.f32 %v1936_v25, %v2455_v20 }
  0xca   :  { %v1941_v26 = vpop.f32.mrf.mxu1  ;;  %v105_v29 = vpop.f32.mrf.mxu0 }
  0xcb   :  { %v2467_v28 = vadd.f32 %v1941_v26, %v2455_v20  ;;  %v106_v38 = vadd.f32 %v2455_v20, %v105_v29 }
  0xcc   :  { %v124_v30 = vpop.f32.mrf.mxu1  ;;  %v1937_v32 = vpop.f32.mrf.mxu0 }
  0xcd   :  { %v2470_v31 = vadd.f32 %v2455_v20, %v124_v30  ;;  %v2473_v34 = vadd.f32 %v1937_v32, %v2455_v20 }
  0xce   :  { %v205_v33 = vpop.f32.mrf.mxu1  ;;  %v108_v62 = vpop.f32.mrf.mxu0 }
  0xcf   :  { %v206_v63 = vadd.f32 %v2514_v61, %v205_v33  ;;  %v109_v5 = vadd.f32 %v2455_v20, %v108_v62 }
  0xd0   :  { %v1948_v35 = vpop.f32.mrf.mxu1 }
  0xd2   :  { %v208_v36 = vpop.f32.mrf.mxu1 }
  0xd4   :  { %v1949_v37 = vpop.f32.mrf.mxu1 }
  0xd6   :  { %v257_v39 = vpop.f32.mrf.mxu1 }
  0xd7   :  { %v263_v40 = vadd.f32 %v257_v39, %v106_v38 }
  0xd8   :  { %v1956_v41 = vpop.f32.mrf.mxu1 }
  0xd9   :  { %2166 = vtanh.f32 %v263_v40  ;;  %v1802_v45 = vmul.f32 -1.442695, %v263_v40 }
  0xda   :  { %v260_v42 = vpop.f32.mrf.mxu1 }
  0xdb   :  { %2168 = vpow2.f32 %v1802_v45 }
  0xdc   :  { %v1957_v43 = vpop.f32.mrf.mxu1 }
  0xe6   :  { %v2167_v44 = vpop.eup %2166 }
  0xe7   :  { %273 = vrot.lane.b32.xlu0 %v2167_v44, %s2324_s3 }
  0xe8   :  { %v2169_v46 = vpop.eup %2168 }
  0xe9   :  { %v267_v47 = vadd.f32 1.0, %v2169_v46 }
  0xeb   :  { %2170 = vrcp.f32 %v267_v47 }
  0xf8   :  { %v2171_v48 = vpop.eup %2170 }
  0xf9   :  { %v271_v51 = vmul.f32 0.0, %v2171_v48 }
 0x159   :  { %v274_v49 = vpop.permute.xlu0 %273 }
 0x15a   :  { %v276_v50 = vmul.f32 %v2171_v48, %v274_v49 }
 0x15c   :  { %278 = vrot.lane.b32.xlu0 %v276_v50, %s2325_s13 }
 0x1ce   :  { %v279_v52 = vpop.permute.xlu0 %278 }
 0x1cf   :  { %v2478_v53 = vadd.f32 %v279_v52, %v271_v51 }
 0x1d1   :  { %2172 = vtanh.f32 %v2478_v53 }
 0x1de   :  { %v2173_v56 = vpop.eup %2172 }
 0x1df   :  { %284 = vrot.lane.b32.xlu1 %v2173_v56, %s2324_s3 }
 0x251   :  { %v285_v57 = vpop.permute.xlu1 %284 }
 0x252   :  { %v287_v58 = vmul.f32 %v2171_v48, %v285_v57 }
 0x254   :  { %v288_v59 = vpack.c.bf16 %v287_v58, %v287_v58 }
 0x256   :  { %290 = vrot.lane.b32.xlu1 %v288_v59, %s2325_s13 }
 0x2c8   :  { %v291_v60 = vpop.permute.xlu1 %290 }
 0x2c9   :  { %1963 = vmatmul.mubr.msk.bf16.vlgmr.msra.gmra.mxu0 %vm167_vm3, %v291_v60 }
 0x2ca   :  { %1975 = vmatpush3.bf16.msra.mxu0 %v2432_v17  ;;  %1978 = vmatprep.mubr.msk.bf16.mxu0 %vm2322_vm2, %v2321_v9 }
 0x2cb   :  { %1976 = vmatprep.subr.bf16.mxu0 %v2321_v9 }
 0x2ce   :  { %1977 = vmatpush3.bf16.msra.mxu0 %v2439_v19 }
 0x2cf   :  { %1990 = vmatprep.subr.bf16.mxu0 %v2321_v9 }
 0x2d1   :  { %1979 = vmatmul.mubr.msk.bf16.vlgmr.msra.gmra.mxu0 %vm167_vm3, %v291_v60 }
 0x2d2   :  { %1991 = vmatpush3.bf16.msra.mxu0 %v2397_v8  ;;  %1994 = vmatprep.mubr.msk.bf16.mxu0 %vm2322_vm2, %v2321_v9 }
 0x2d3   :  { %1992 = vmatprep.subr.bf16.mxu0 %v2321_v9 }
 0x2d6   :  { %1993 = vmatpush3.bf16.msra.mxu0 %v2419_v16 }
 0x2d7   :  { %2006 = vmatprep.subr.bf16.mxu0 %v2321_v9 }
 0x389   :  { %v341_v0 = vpop.f32.mrf.mxu0 }
 0x38a   :  { %v342_v1 = vadd.f32 %v341_v0, %v206_v63 }
 0x38b   :  { %v1964_v2 = vpop.f32.mrf.mxu0 }
 0x38c   :  { %2174 = vtanh.f32 %v342_v1  ;;  %v1806_v15 = vmul.f32 -1.442695, %v342_v1 }
 0x38d   :  { %v344_v3 = vpop.f32.mrf.mxu0 }
 0x38f   :  { %v1965_v4 = vpop.f32.mrf.mxu0 }
 0x391   :  { %v452_v6 = vpop.f32.mrf.mxu0 }
 0x392   :  { %v458_v7 = vadd.f32 %v452_v6, %v109_v5 }
 0x393   :  { %v1980_v10 = vpop.f32.mrf.mxu0 }
 0x394   :  { %2176 = vtanh.f32 %v458_v7  ;;  %v1809_v18 = vmul.f32 -1.442695, %v458_v7 }
 0x395   :  { %v455_v11 = vpop.f32.mrf.mxu0  ;;  %2178 = vpow2.f32 %v1806_v15 }
 0x396   :  { %2180 = vpow2.f32 %v1809_v18 }
 0x397   :  { %v1981_v12 = vpop.f32.mrf.mxu0 }
 0x399   :  { %v2175_v13 = vpop.eup %2174 }
 0x39a   :  { %356 = vrot.lane.b32.xlu0 %v2175_v13, %s2324_s3 }
 0x3a1   :  { %v2177_v14 = vpop.eup %2176 }
 0x3a2   :  { %468 = vrot.lane.b32.xlu1 %v2177_v14, %s2324_s3  ;;  %v2179_v21 = vpop.eup %2178 }
 0x3a3   :  { %v350_v23 = vadd.f32 1.0, %v2179_v21  ;;  %v2181_v20 = vpop.eup %2180 }
 0x3a4   :  { %v462_v25 = vadd.f32 1.0, %v2181_v20 }
 0x3a5   :  { %2182 = vrcp.f32 %v350_v23 }
 0x3a6   :  { %2184 = vrcp.f32 %v462_v25 }
 0x3b2   :  { %v2183_v26 = vpop.eup %2182 }
 0x3b3   :  { %v2185_v32 = vpop.eup %2184  ;;  %v354_v36 = vmul.f32 0.0, %v2183_v26 }
 0x3b4   :  { %v466_v39 = vmul.f32 %v2185_v32, %v2478_v53 }
 0x40c   :  { %v357_v29 = vpop.permute.xlu0 %356 }
 0x40d   :  { %v359_v30 = vmul.f32 %v2183_v26, %v357_v29 }
 0x40f   :  { %361 = vrot.lane.b32.xlu0 %v359_v30, %s2325_s13 }
 0x414   :  { %v469_v33 = vpop.permute.xlu1 %468 }
 0x415   :  { %v471_v35 = vmul.f32 %v2185_v32, %v469_v33 }
 0x417   :  { %473 = vrot.lane.b32.xlu1 %v471_v35, %s2325_s13 }
 0x481   :  { %v362_v37 = vpop.permute.xlu0 %361 }
 0x482   :  { %v2522_v38 = vadd.f32 %v362_v37, %v354_v36 }
 0x484   :  { %2186 = vtanh.f32 %v2522_v38 }
 0x489   :  { %v474_v40 = vpop.permute.xlu1 %473 }
 0x48a   :  { %v2526_v41 = vadd.f32 %v474_v40, %v466_v39 }
 0x48c   :  { %2188 = vtanh.f32 %v2526_v41 }
 0x491   :  { %v2187_v42 = vpop.eup %2186 }
 0x492   :  { %367 = vrot.lane.b32.xlu0 %v2187_v42, %s2324_s3 }
 0x499   :  { %v2189_v43 = vpop.eup %2188 }
 0x49a   :  { %479 = vrot.lane.b32.xlu1 %v2189_v43, %s2324_s3 }
 0x504   :  { %v368_v44 = vpop.permute.xlu0 %367 }
 0x505   :  { %v2531_v45 = vmul.f32 %v2183_v26, %v368_v44 }
 0x507   :  { %v371_v46 = vpack.c.bf16 %v2531_v45, %v2531_v45 }
 0x509   :  { %373 = vrot.lane.b32.xlu0 %v371_v46, %s2325_s13 }
 0x50c   :  { %v480_v47 = vpop.permute.xlu1 %479 }
 0x50d   :  { %v482_v48 = vmul.f32 %v2185_v32, %v480_v47 }
 0x50f   :  { %v483_v49 = vpack.c.bf16 %v482_v48, %v482_v48 }
 0x511   :  { %485 = vrot.lane.b32.xlu1 %v483_v49, %s2325_s13 }
 0x57b   :  { %v374_v50 = vpop.permute.xlu0 %373 }
 0x57c   :  { %1971 = vmatmul.mubr.msk.bf16.vlgmr.msra.gmra.mxu1 %vm167_vm3, %v374_v50 }
 0x57d   :  { %1983 = vmatpush3.bf16.msra.mxu1 %v2484_v54  ;;  %1986 = vmatprep.mubr.msk.bf16.mxu1 %vm2322_vm2, %v2321_v9 }
 0x57e   :  { %1984 = vmatprep.subr.bf16.mxu1 %v2321_v9 }
 0x581   :  { %1985 = vmatpush3.bf16.msra.mxu1 %v2490_v55 }
 0x582   :  { %1998 = vmatprep.subr.bf16.mxu1 %v2321_v9 }
 0x583   :  { %v486_v51 = vpop.permute.xlu1 %485 }
 0x584   :  { %1987 = vmatmul.mubr.msk.bf16.vlgmr.msra.gmra.mxu1 %vm167_vm3, %v486_v51 }
 0x585   :  { %1999 = vmatpush3.bf16.msra.mxu1 %v2432_v17  ;;  %2002 = vmatprep.mubr.msk.bf16.mxu1 %vm2322_vm2, %v2321_v9 }
 0x586   :  { %2000 = vmatprep.subr.bf16.mxu1 %v2321_v9 }
 0x589   :  { %2001 = vmatpush3.bf16.msra.mxu1 %v2439_v19 }
 0x58a   :  { %2014 = vmatprep.subr.bf16.mxu1 %v2321_v9 }
 0x58c   :  { %2003 = vmatmul.mubr.msk.bf16.vlgmr.msra.gmra.mxu1 %vm167_vm3, %v486_v51 }
 0x58d   :  { %2015 = vmatpush3.bf16.msra.mxu1 %v2397_v8  ;;  %2018 = vmatprep.mubr.msk.bf16.mxu1 %vm2322_vm2, %v2321_v9 }
 0x58e   :  { %2016 = vmatprep.subr.bf16.mxu1 %v2321_v9 }
 0x591   :  { %2017 = vmatpush3.bf16.msra.mxu1 %v2419_v16 }
 0x592   :  { %2030 = vmatprep.subr.bf16.mxu1 %v2321_v9 }
 0x63c   :  { %v412_v52 = vpop.f32.mrf.mxu1 }
 0x63d   :  { %v413_v58 = vadd.f32 %v2514_v61, %v412_v52 }
 0x63e   :  { %v1972_v53 = vpop.f32.mrf.mxu1 }
 0x640   :  { %v415_v56 = vpop.f32.mrf.mxu1 }
 0x642   :  { %v1973_v57 = vpop.f32.mrf.mxu1 }
 0x644   :  { %v524_v59 = vpop.f32.mrf.mxu1 }
 0x645   :  { %v525_v60 = vadd.f32 %v524_v59, %v413_v58 }
 0x646   :  { %v1988_v62 = vpop.f32.mrf.mxu1 }
 0x647   :  { %2190 = vtanh.f32 %v525_v60  ;;  %v1811_v10 = vmul.f32 -1.442695, %v525_v60 }
 0x648   :  { %v527_v63 = vpop.f32.mrf.mxu1 }
 0x64a   :  { %v1989_v0 = vpop.f32.mrf.mxu1 }
 0x64c   :  { %v635_v1 = vpop.f32.mrf.mxu1 }
 0x64d   :  { %v641_v2 = vadd.f32 %v635_v1, %v2464_v27 }
 0x64e   :  { %v2004_v3 = vpop.f32.mrf.mxu1 }
 0x64f   :  { %2192 = vtanh.f32 %v641_v2  ;;  %v1814_v11 = vmul.f32 -1.442695, %v641_v2 }
 0x650   :  { %v638_v4 = vpop.f32.mrf.mxu1  ;;  %2194 = vpow2.f32 %v1811_v10 }
 0x651   :  { %2196 = vpow2.f32 %v1814_v11 }
 0x652   :  { %v2005_v5 = vpop.f32.mrf.mxu1 }
 0x654   :  { %v2191_v6 = vpop.eup %2190 }
 0x655   :  { %539 = vrot.lane.b32.xlu0 %v2191_v6, %s2324_s3 }
 0x65c   :  { %v2193_v7 = vpop.eup %2192 }
 0x65d   :  { %651 = vrot.lane.b32.xlu1 %v2193_v7, %s2324_s3  ;;  %v2195_v12 = vpop.eup %2194 }
 0x65e   :  { %v533_v13 = vadd.f32 1.0, %v2195_v12  ;;  %v2197_v14 = vpop.eup %2196 }
 0x65f   :  { %v645_v15 = vadd.f32 1.0, %v2197_v14 }
 0x660   :  { %2198 = vrcp.f32 %v533_v13 }
 0x661   :  { %2200 = vrcp.f32 %v645_v15 }
 0x66d   :  { %v2199_v27 = vpop.eup %2198 }
 0x66e   :  { %v2201_v23 = vpop.eup %2200  ;;  %v537_v26 = vmul.f32 %v2199_v27, %v2522_v38 }
 0x66f   :  { %v649_v32 = vmul.f32 %v2201_v23, %v2526_v41 }
 0x6c7   :  { %v540_v18 = vpop.permute.xlu0 %539 }
 0x6c8   :  { %v542_v21 = vmul.f32 %v2199_v27, %v540_v18 }
 0x6ca   :  { %544 = vrot.lane.b32.xlu0 %v542_v21, %s2325_s13 }
 0x6cf   :  { %v652_v20 = vpop.permute.xlu1 %651 }
 0x6d0   :  { %v654_v25 = vmul.f32 %v2201_v23, %v652_v20 }
 0x6d2   :  { %656 = vrot.lane.b32.xlu1 %v654_v25, %s2325_s13 }
 0x73c   :  { %v545_v29 = vpop.permute.xlu0 %544 }
 0x73d   :  { %v2565_v30 = vadd.f32 %v545_v29, %v537_v26 }
 0x73f   :  { %2202 = vtanh.f32 %v2565_v30 }
 0x744   :  { %v657_v33 = vpop.permute.xlu1 %656 }
 0x745   :  { %v2569_v35 = vadd.f32 %v657_v33, %v649_v32 }
 0x747   :  { %2204 = vtanh.f32 %v2569_v35 }
 0x74c   :  { %v2203_v36 = vpop.eup %2202 }
 0x74d   :  { %550 = vrot.lane.b32.xlu0 %v2203_v36, %s2324_s3 }
 0x754   :  { %v2205_v37 = vpop.eup %2204 }
 0x755   :  { %662 = vrot.lane.b32.xlu1 %v2205_v37, %s2324_s3 }
 0x7bf   :  { %v551_v39 = vpop.permute.xlu0 %550 }
 0x7c0   :  { %v2574_v38 = vmul.f32 %v2199_v27, %v551_v39 }
 0x7c2   :  { %v554_v40 = vpack.c.bf16 %v2574_v38, %v2574_v38 }
 0x7c4   :  { %556 = vrot.lane.b32.xlu0 %v554_v40, %s2325_s13 }
 0x7c7   :  { %v663_v41 = vpop.permute.xlu1 %662 }
 0x7c8   :  { %v665_v42 = vmul.f32 %v2201_v23, %v663_v41 }
 0x7ca   :  { %v666_v43 = vpack.c.bf16 %v665_v42, %v665_v42 }
 0x7cc   :  { %668 = vrot.lane.b32.xlu1 %v666_v43, %s2325_s13 }
 0x836   :  { %v557_v44 = vpop.permute.xlu0 %556 }
 0x837   :  { %1995 = vmatmul.mubr.msk.bf16.vlgmr.msra.gmra.mxu0 %vm167_vm3, %v557_v44 }
 0x838   :  { %2007 = vmatpush3.bf16.msra.mxu0 %v2484_v54  ;;  %2010 = vmatprep.mubr.msk.bf16.mxu0 %vm2322_vm2, %v2321_v9 }
 0x839   :  { %2008 = vmatprep.subr.bf16.mxu0 %v2321_v9 }
 0x83c   :  { %2009 = vmatpush3.bf16.msra.mxu0 %v2490_v55 }
 0x83d   :  { %2022 = vmatprep.subr.bf16.mxu0 %v2321_v9 }
 0x83e   :  { %v669_v46 = vpop.permute.xlu1 %668 }
 0x83f   :  { %2011 = vmatmul.mubr.msk.bf16.vlgmr.msra.gmra.mxu0 %vm167_vm3, %v669_v46 }
 0x840   :  { %2023 = vmatpush3.bf16.msra.mxu0 %v2432_v17  ;;  %2026 = vmatprep.mubr.msk.bf16.mxu0 %vm2322_vm2, %v2321_v9 }
 0x841   :  { %2024 = vmatprep.subr.bf16.mxu0 %v2321_v9 }
 0x844   :  { %2025 = vmatpush3.bf16.msra.mxu0 %v2439_v19 }
 0x845   :  { %2038 = vmatprep.subr.bf16.mxu0 %v2321_v9 }
 0x847   :  { %2027 = vmatmul.mubr.msk.bf16.vlgmr.msra.gmra.mxu0 %vm167_vm3, %v669_v46 }
 0x848   :  { %2039 = vmatpush3.bf16.msra.mxu0 %v2397_v8  ;;  %2042 = vmatprep.mubr.msk.bf16.mxu0 %vm2322_vm2, %v2321_v9 }
 0x849   :  { %2040 = vmatprep.subr.bf16.mxu0 %v2321_v9 }
 0x84c   :  { %2041 = vmatpush3.bf16.msra.mxu0 %v2419_v16 }
 0x84d   :  { %2054 = vmatprep.subr.bf16.mxu0 %v2321_v9 }
 0x8f7   :  { %v595_v47 = vpop.f32.mrf.mxu0 }
 0x8f8   :  { %v596_v51 = vadd.f32 %v2514_v61, %v595_v47 }
 0x8f9   :  { %v1996_v48 = vpop.f32.mrf.mxu0 }
 0x8fb   :  { %v598_v49 = vpop.f32.mrf.mxu0 }
 0x8fd   :  { %v1997_v50 = vpop.f32.mrf.mxu0 }
 0x8ff   :  { %v707_v52 = vpop.f32.mrf.mxu0 }
 0x900   :  { %v708_v53 = vadd.f32 %v707_v52, %v596_v51 }
 0x901   :  { %v2012_v56 = vpop.f32.mrf.mxu0 }
 0x902   :  { %2206 = vtanh.f32 %v708_v53  ;;  %v1816_v3 = vmul.f32 -1.442695, %v708_v53 }
 0x903   :  { %v710_v57 = vpop.f32.mrf.mxu0 }
 0x905   :  { %v2013_v58 = vpop.f32.mrf.mxu0 }
 0x907   :  { %v818_v59 = vpop.f32.mrf.mxu0 }
 0x908   :  { %v824_v60 = vadd.f32 %v818_v59, %v2473_v34 }
 0x909   :  { %v2028_v62 = vpop.f32.mrf.mxu0 }
 0x90a   :  { %2208 = vtanh.f32 %v824_v60  ;;  %v1819_v4 = vmul.f32 -1.442695, %v824_v60 }
 0x90b   :  { %v821_v63 = vpop.f32.mrf.mxu0  ;;  %2210 = vpow2.f32 %v1816_v3 }
 0x90c   :  { %2212 = vpow2.f32 %v1819_v4 }
 0x90d   :  { %v2029_v0 = vpop.f32.mrf.mxu0 }
 0x90f   :  { %v2207_v1 = vpop.eup %2206 }
 0x910   :  { %722 = vrot.lane.b32.xlu0 %v2207_v1, %s2324_s3 }
 0x917   :  { %v2209_v2 = vpop.eup %2208 }
 0x918   :  { %834 = vrot.lane.b32.xlu1 %v2209_v2, %s2324_s3  ;;  %v2211_v5 = vpop.eup %2210 }
 0x919   :  { %v716_v6 = vadd.f32 1.0, %v2211_v5  ;;  %v2213_v7 = vpop.eup %2212 }
 0x91a   :  { %v828_v10 = vadd.f32 1.0, %v2213_v7 }
 0x91b   :  { %2214 = vrcp.f32 %v716_v6 }
 0x91c   :  { %2216 = vrcp.f32 %v828_v10 }
 0x928   :  { %v2215_v34 = vpop.eup %2214 }
 0x929   :  { %v2217_v13 = vpop.eup %2216  ;;  %v720_v27 = vmul.f32 %v2215_v34, %v2565_v30 }
 0x92a   :  { %v832_v23 = vmul.f32 %v2217_v13, %v2569_v35 }
 0x982   :  { %v723_v11 = vpop.permute.xlu0 %722 }
 0x983   :  { %v725_v12 = vmul.f32 %v2215_v34, %v723_v11 }
 0x985   :  { %727 = vrot.lane.b32.xlu0 %v725_v12, %s2325_s13 }
 0x98a   :  { %v835_v14 = vpop.permute.xlu1 %834 }
 0x98b   :  { %v837_v15 = vmul.f32 %v2217_v13, %v835_v14 }
 0x98d   :  { %839 = vrot.lane.b32.xlu1 %v837_v15, %s2325_s13 }
 0x9f7   :  { %v728_v18 = vpop.permute.xlu0 %727 }
 0x9f8   :  { %v2608_v21 = vadd.f32 %v728_v18, %v720_v27 }
 0x9fa   :  { %2218 = vtanh.f32 %v2608_v21 }
 0x9ff   :  { %v840_v20 = vpop.permute.xlu1 %839 }
 0xa00   :  { %v2612_v25 = vadd.f32 %v840_v20, %v832_v23 }
 0xa02   :  { %2220 = vtanh.f32 %v2612_v25 }
 0xa07   :  { %v2219_v26 = vpop.eup %2218 }
 0xa08   :  { %733 = vrot.lane.b32.xlu0 %v2219_v26, %s2324_s3 }
 0xa0f   :  { %v2221_v29 = vpop.eup %2220 }
 0xa10   :  { %845 = vrot.lane.b32.xlu1 %v2221_v29, %s2324_s3 }
 0xa7a   :  { %v734_v32 = vpop.permute.xlu0 %733 }
 0xa7b   :  { %v2617_v30 = vmul.f32 %v2215_v34, %v734_v32 }
 0xa7d   :  { %v737_v33 = vpack.c.bf16 %v2617_v30, %v2617_v30 }
 0xa7f   :  { %739 = vrot.lane.b32.xlu0 %v737_v33, %s2325_s13 }
 0xa82   :  { %v846_v35 = vpop.permute.xlu1 %845 }
 0xa83   :  { %v848_v36 = vmul.f32 %v2217_v13, %v846_v35 }
 0xa85   :  { %v849_v37 = vpack.c.bf16 %v848_v36, %v848_v36 }
 0xa87   :  { %851 = vrot.lane.b32.xlu1 %v849_v37, %s2325_s13 }
 0xaf1   :  { %v740_v39 = vpop.permute.xlu0 %739 }
 0xaf2   :  { %2019 = vmatmul.mubr.msk.bf16.vlgmr.msra.gmra.mxu1 %vm167_vm3, %v740_v39 }
 0xaf3   :  { %2031 = vmatpush3.bf16.msra.mxu1 %v2484_v54  ;;  %2034 = vmatprep.mubr.msk.bf16.mxu1 %vm2322_vm2, %v2321_v9 }
 0xaf4   :  { %2032 = vmatprep.subr.bf16.mxu1 %v2321_v9 }
 0xaf7   :  { %2033 = vmatpush3.bf16.msra.mxu1 %v2490_v55 }
 0xaf8   :  { %2046 = vmatprep.subr.bf16.mxu1 %v2321_v9 }
 0xaf9   :  { %v852_v40 = vpop.permute.xlu1 %851 }
 0xafa   :  { %2035 = vmatmul.mubr.msk.bf16.vlgmr.msra.gmra.mxu1 %vm167_vm3, %v852_v40 }
 0xafb   :  { %2047 = vmatpush3.bf16.msra.mxu1 %v2432_v17  ;;  %2050 = vmatprep.mubr.msk.bf16.mxu1 %vm2322_vm2, %v2321_v9 }
 0xafc   :  { %2048 = vmatprep.subr.bf16.mxu1 %v2321_v9 }
 0xaff   :  { %2049 = vmatpush3.bf16.msra.mxu1 %v2439_v19 }
 0xb00   :  { %2062 = vmatprep.subr.bf16.mxu1 %v2321_v9 }
 0xb02   :  { %2051 = vmatmul.mubr.msk.bf16.vlgmr.msra.gmra.mxu1 %vm167_vm3, %v852_v40 }
 0xb03   :  { %2063 = vmatpush3.bf16.msra.mxu1 %v2397_v8  ;;  %2066 = vmatprep.mubr.msk.bf16.mxu1 %vm2322_vm2, %v2321_v9 }
 0xb04   :  { %2064 = vmatprep.subr.bf16.mxu1 %v2321_v9 }
 0xb07   :  { %2065 = vmatpush3.bf16.msra.mxu1 %v2419_v16 }
 0xb08   :  { %2078 = vmatprep.subr.bf16.mxu1 %v2321_v9 }
 0xbb2   :  { %v778_v41 = vpop.f32.mrf.mxu1 }
 0xbb3   :  { %v779_v46 = vadd.f32 %v2514_v61, %v778_v41 }
 0xbb4   :  { %v2020_v42 = vpop.f32.mrf.mxu1 }
 0xbb6   :  { %v781_v43 = vpop.f32.mrf.mxu1 }
 0xbb8   :  { %v2021_v44 = vpop.f32.mrf.mxu1 }
 0xbba   :  { %v890_v47 = vpop.f32.mrf.mxu1 }
 0xbbb   :  { %v891_v48 = vadd.f32 %v890_v47, %v779_v46 }
 0xbbc   :  { %v2036_v49 = vpop.f32.mrf.mxu1 }
 0xbbd   :  { %2222 = vtanh.f32 %v891_v48  ;;  %v1821_v62 = vmul.f32 -1.442695, %v891_v48 }
 0xbbe   :  { %v893_v50 = vpop.f32.mrf.mxu1 }
 0xbc0   :  { %v2037_v51 = vpop.f32.mrf.mxu1 }
 0xbc2   :  { %v1001_v52 = vpop.f32.mrf.mxu1 }
 0xbc3   :  { %v1007_v53 = vadd.f32 %v1001_v52, %v2461_v24 }
 0xbc4   :  { %v2052_v56 = vpop.f32.mrf.mxu1 }
 0xbc5   :  { %2224 = vtanh.f32 %v1007_v53  ;;  %v1824_v63 = vmul.f32 -1.442695, %v1007_v53 }
 0xbc6   :  { %v1004_v57 = vpop.f32.mrf.mxu1  ;;  %2226 = vpow2.f32 %v1821_v62 }
 0xbc7   :  { %2228 = vpow2.f32 %v1824_v63 }
 0xbc8   :  { %v2053_v58 = vpop.f32.mrf.mxu1 }
 0xbca   :  { %v2223_v59 = vpop.eup %2222 }
 0xbcb   :  { %905 = vrot.lane.b32.xlu0 %v2223_v59, %s2324_s3 }
 0xbd2   :  { %v2225_v60 = vpop.eup %2224 }
 0xbd3   :  { %1017 = vrot.lane.b32.xlu1 %v2225_v60, %s2324_s3  ;;  %v2227_v0 = vpop.eup %2226 }
 0xbd4   :  { %v899_v1 = vadd.f32 1.0, %v2227_v0  ;;  %v2229_v2 = vpop.eup %2228 }
 0xbd5   :  { %v1011_v3 = vadd.f32 1.0, %v2229_v2 }
 0xbd6   :  { %2230 = vrcp.f32 %v899_v1 }
 0xbd7   :  { %2232 = vrcp.f32 %v1011_v3 }
 0xbe3   :  { %v2231_v24 = vpop.eup %2230 }
 0xbe4   :  { %v2233_v6 = vpop.eup %2232  ;;  %v903_v34 = vmul.f32 %v2231_v24, %v2608_v21 }
 0xbe5   :  { %v1015_v13 = vmul.f32 %v2233_v6, %v2612_v25 }
 0xc3d   :  { %v906_v4 = vpop.permute.xlu0 %905 }
 0xc3e   :  { %v908_v5 = vmul.f32 %v2231_v24, %v906_v4 }
 0xc40   :  { %910 = vrot.lane.b32.xlu0 %v908_v5, %s2325_s13 }
 0xc45   :  { %v1018_v7 = vpop.permute.xlu1 %1017 }
 0xc46   :  { %v1020_v10 = vmul.f32 %v2233_v6, %v1018_v7 }
 0xc48   :  { %1022 = vrot.lane.b32.xlu1 %v1020_v10, %s2325_s13 }
 0xcb2   :  { %v911_v11 = vpop.permute.xlu0 %910 }
 0xcb3   :  { %v2651_v12 = vadd.f32 %v911_v11, %v903_v34 }
 0xcb5   :  { %2234 = vtanh.f32 %v2651_v12 }
 0xcba   :  { %v1023_v14 = vpop.permute.xlu1 %1022 }
 0xcbb   :  { %v2655_v15 = vadd.f32 %v1023_v14, %v1015_v13 }
 0xcbd   :  { %2236 = vtanh.f32 %v2655_v15 }
 0xcc2   :  { %v2235_v27 = vpop.eup %2234 }
 0xcc3   :  { %916 = vrot.lane.b32.xlu0 %v2235_v27, %s2324_s3 }
 0xcca   :  { %v2237_v18 = vpop.eup %2236 }
 0xccb   :  { %1028 = vrot.lane.b32.xlu1 %v2237_v18, %s2324_s3 }
 0xd35   :  { %v917_v23 = vpop.permute.xlu0 %916 }
 0xd36   :  { %v2660_v21 = vmul.f32 %v2231_v24, %v917_v23 }
 0xd38   :  { %v920_v20 = vpack.c.bf16 %v2660_v21, %v2660_v21 }
 0xd3a   :  { %922 = vrot.lane.b32.xlu0 %v920_v20, %s2325_s13 }
 0xd3d   :  { %v1029_v25 = vpop.permute.xlu1 %1028 }
 0xd3e   :  { %v1031_v26 = vmul.f32 %v2233_v6, %v1029_v25 }
 0xd40   :  { %v1032_v29 = vpack.c.bf16 %v1031_v26, %v1031_v26 }
 0xd42   :  { %1034 = vrot.lane.b32.xlu1 %v1032_v29, %s2325_s13 }
 0xdac   :  { %v923_v32 = vpop.permute.xlu0 %922 }
 0xdad   :  { %2043 = vmatmul.mubr.msk.bf16.vlgmr.msra.gmra.mxu0 %vm167_vm3, %v923_v32 }
 0xdae   :  { %2055 = vmatpush3.bf16.msra.mxu0 %v2484_v54  ;;  %2058 = vmatprep.mubr.msk.bf16.mxu0 %vm2322_vm2, %v2321_v9 }
 0xdaf   :  { %2056 = vmatprep.subr.bf16.mxu0 %v2321_v9 }
 0xdb2   :  { %2057 = vmatpush3.bf16.msra.mxu0 %v2490_v55 }
 0xdb3   :  { %2070 = vmatprep.subr.bf16.mxu0 %v2321_v9 }
 0xdb4   :  { %v1035_v33 = vpop.permute.xlu1 %1034 }
 0xdb5   :  { %2059 = vmatmul.mubr.msk.bf16.vlgmr.msra.gmra.mxu0 %vm167_vm3, %v1035_v33 }
 0xdb6   :  { %2071 = vmatpush3.bf16.msra.mxu0 %v2432_v17  ;;  %2074 = vmatprep.mubr.msk.bf16.mxu0 %vm2322_vm2, %v2321_v9 }
 0xdb7   :  { %2072 = vmatprep.subr.bf16.mxu0 %v2321_v9 }
 0xdba   :  { %2073 = vmatpush3.bf16.msra.mxu0 %v2439_v19 }
 0xdbb   :  { %2086 = vmatprep.subr.bf16.mxu0 %v2321_v9 }
 0xdbd   :  { %2075 = vmatmul.mubr.msk.bf16.vlgmr.msra.gmra.mxu0 %vm167_vm3, %v1035_v33 }
 0xdbe   :  { %2087 = vmatpush3.bf16.msra.mxu0 %v2397_v8  ;;  %2090 = vmatprep.mubr.msk.bf16.mxu0 %vm2322_vm2, %v2321_v9 }
 0xdbf   :  { %2088 = vmatprep.subr.bf16.mxu0 %v2321_v9 }
 0xdc2   :  { %2089 = vmatpush3.bf16.msra.mxu0 %v2419_v16 }
 0xdc3   :  { %2102 = vmatprep.subr.bf16.mxu0 %v2321_v9 }
 0xe6d   :  { %v961_v35 = vpop.f32.mrf.mxu0 }
 0xe6e   :  { %v962_v40 = vadd.f32 %v2514_v61, %v961_v35 }
 0xe6f   :  { %v2044_v36 = vpop.f32.mrf.mxu0 }
 0xe71   :  { %v964_v37 = vpop.f32.mrf.mxu0 }
 0xe73   :  { %v2045_v39 = vpop.f32.mrf.mxu0 }
 0xe75   :  { %v1073_v41 = vpop.f32.mrf.mxu0 }
 0xe76   :  { %v1074_v42 = vadd.f32 %v1073_v41, %v962_v40 }
 0xe77   :  { %v2060_v43 = vpop.f32.mrf.mxu0 }
 0xe78   :  { %2238 = vtanh.f32 %v1074_v42  ;;  %v1826_v56 = vmul.f32 -1.442695, %v1074_v42 }
 0xe79   :  { %v1076_v44 = vpop.f32.mrf.mxu0 }
 0xe7b   :  { %v2061_v46 = vpop.f32.mrf.mxu0 }
 0xe7d   :  { %v1184_v47 = vpop.f32.mrf.mxu0 }
 0xe7e   :  { %v1190_v48 = vadd.f32 %v1184_v47, %v2470_v31 }
 0xe7f   :  { %v2076_v49 = vpop.f32.mrf.mxu0 }
 0xe80   :  { %2240 = vtanh.f32 %v1190_v48  ;;  %v1829_v57 = vmul.f32 -1.442695, %v1190_v48 }
 0xe81   :  { %v1187_v50 = vpop.f32.mrf.mxu0  ;;  %2242 = vpow2.f32 %v1826_v56 }
 0xe82   :  { %2244 = vpow2.f32 %v1829_v57 }
 0xe83   :  { %v2077_v51 = vpop.f32.mrf.mxu0 }
 0xe85   :  { %v2239_v52 = vpop.eup %2238 }
 0xe86   :  { %1088 = vrot.lane.b32.xlu0 %v2239_v52, %s2324_s3 }
 0xe8d   :  { %v2241_v53 = vpop.eup %2240 }
 0xe8e   :  { %1200 = vrot.lane.b32.xlu1 %v2241_v53, %s2324_s3  ;;  %v2243_v58 = vpop.eup %2242 }
 0xe8f   :  { %v1082_v59 = vadd.f32 1.0, %v2243_v58  ;;  %v2245_v60 = vpop.eup %2244 }
 0xe90   :  { %v1194_v62 = vadd.f32 1.0, %v2245_v60 }
 0xe91   :  { %2246 = vrcp.f32 %v1082_v59 }
 0xe92   :  { %2248 = vrcp.f32 %v1194_v62 }
 0xe9e   :  { %v2247_v31 = vpop.eup %2246 }
 0xe9f   :  { %v2249_v1 = vpop.eup %2248  ;;  %v1086_v24 = vmul.f32 %v2247_v31, %v2651_v12 }
 0xea0   :  { %v1198_v6 = vmul.f32 %v2249_v1, %v2655_v15 }
 0xef8   :  { %v1089_v63 = vpop.permute.xlu0 %1088 }
 0xef9   :  { %v1091_v0 = vmul.f32 %v2247_v31, %v1089_v63 }
 0xefb   :  { %1093 = vrot.lane.b32.xlu0 %v1091_v0, %s2325_s13 }
 0xf00   :  { %v1201_v2 = vpop.permute.xlu1 %1200 }
 0xf01   :  { %v1203_v3 = vmul.f32 %v2249_v1, %v1201_v2 }
 0xf03   :  { %1205 = vrot.lane.b32.xlu1 %v1203_v3, %s2325_s13 }
 0xf6d   :  { %v1094_v4 = vpop.permute.xlu0 %1093 }
 0xf6e   :  { %v2694_v5 = vadd.f32 %v1094_v4, %v1086_v24 }
 0xf70   :  { %2250 = vtanh.f32 %v2694_v5 }
 0xf75   :  { %v1206_v7 = vpop.permute.xlu1 %1205 }
 0xf76   :  { %v2698_v10 = vadd.f32 %v1206_v7, %v1198_v6 }
 0xf78   :  { %2252 = vtanh.f32 %v2698_v10 }
 0xf7d   :  { %v2251_v34 = vpop.eup %2250 }
 0xf7e   :  { %1099 = vrot.lane.b32.xlu0 %v2251_v34, %s2324_s3  ;;  %v2294_v34 = vld [vmem:[%s2832_s2 + $0x8] sm:$0xff]  }
 0xf85   :  { %v2253_v11 = vpop.eup %2252 }
 0xf86   :  { %1211 = vrot.lane.b32.xlu1 %v2253_v11, %s2324_s3 }
 0xff0   :  { %v1100_v13 = vpop.permute.xlu0 %1099 }
 0xff1   :  { %v2703_v12 = vmul.f32 %v2247_v31, %v1100_v13 }
 0xff3   :  { %v1103_v14 = vpack.c.bf16 %v2703_v12, %v2703_v12 }
 0xff5   :  { %1105 = vrot.lane.b32.xlu0 %v1103_v14, %s2325_s13 }
 0xff8   :  { %v1212_v15 = vpop.permute.xlu1 %1211 }
 0xff9   :  { %v1214_v27 = vmul.f32 %v2249_v1, %v1212_v15 }
 0xffb   :  { %v1215_v18 = vpack.c.bf16 %v1214_v27, %v1214_v27 }
 0xffd   :  { %1217 = vrot.lane.b32.xlu1 %v1215_v18, %s2325_s13 }
0x1067   :  { %v1106_v23 = vpop.permute.xlu0 %1105 }
0x1068   :  { %2067 = vmatmul.mubr.msk.bf16.vlgmr.msra.gmra.mxu1 %vm167_vm3, %v1106_v23 }
0x1069   :  { %2079 = vmatpush3.bf16.msra.mxu1 %v2484_v54  ;;  %2082 = vmatprep.mubr.msk.bf16.mxu1 %vm2322_vm2, %v2321_v9 }
0x106a   :  { %2080 = vmatprep.subr.bf16.mxu1 %v2321_v9 }
0x106d   :  { %2081 = vmatpush3.bf16.msra.mxu1 %v2490_v55 }
0x106e   :  { %2094 = vmatprep.subr.bf16.mxu1 %v2321_v9 }
0x106f   :  { %v1218_v20 = vpop.permute.xlu1 %1217 }
0x1070   :  { %2083 = vmatmul.mubr.msk.bf16.vlgmr.msra.gmra.mxu1 %vm167_vm3, %v1218_v20 }
0x1071   :  { %2095 = vmatpush3.bf16.msra.mxu1 %v2432_v17  ;;  %2098 = vmatprep.mubr.msk.bf16.mxu1 %vm2322_vm2, %v2321_v9 }
0x1072   :  { %2096 = vmatprep.subr.bf16.mxu1 %v2321_v9 }
0x1075   :  { %2097 = vmatpush3.bf16.msra.mxu1 %v2439_v19 }
0x1076   :  { %2110 = vmatprep.subr.bf16.mxu1 %v2321_v9 }
0x1078   :  { %2099 = vmatmul.mubr.msk.bf16.vlgmr.msra.gmra.mxu1 %vm167_vm3, %v1218_v20 }
0x1079   :  { %2111 = vmatpush3.bf16.msra.mxu1 %v2397_v8  ;;  %2114 = vmatprep.mubr.msk.bf16.mxu1 %vm2322_vm2, %v2321_v9 }
0x107a   :  { %2112 = vmatprep.subr.bf16.mxu1 %v2321_v9 }
0x107d   :  { %2113 = vmatpush3.bf16.msra.mxu1 %v2419_v16 }
0x107e   :  { %2126 = vmatprep.subr.bf16.mxu1 %v2321_v9 }
0x1128   :  { %v1144_v17 = vpop.f32.mrf.mxu1 }
0x1129   :  { %v1145_v19 = vadd.f32 %v2514_v61, %v1144_v17 }
0x112a   :  { %v2068_v25 = vpop.f32.mrf.mxu1 }
0x112c   :  { %v1147_v26 = vpop.f32.mrf.mxu1 }
0x112e   :  { %v2069_v29 = vpop.f32.mrf.mxu1 }
0x1130   :  { %v1256_v32 = vpop.f32.mrf.mxu1 }
0x1131   :  { %v1257_v33 = vadd.f32 %v1256_v32, %v1145_v19 }
0x1132   :  { %v2084_v35 = vpop.f32.mrf.mxu1 }
0x1133   :  { %2254 = vtanh.f32 %v1257_v33  ;;  %v1831_v44 = vmul.f32 -1.442695, %v1257_v33 }
0x1134   :  { %v1259_v8 = vpop.f32.mrf.mxu1 }
0x1136   :  { %v2085_v36 = vpop.f32.mrf.mxu1 }
0x1138   :  { %v1367_v37 = vpop.f32.mrf.mxu1 }
0x1139   :  { %v1373_v39 = vadd.f32 %v1367_v37, %v2458_v22 }
0x113a   :  { %v2100_v40 = vpop.f32.mrf.mxu1 }
0x113b   :  { %2256 = vtanh.f32 %v1373_v39  ;;  %v1834_v46 = vmul.f32 -1.442695, %v1373_v39 }
0x113c   :  { %v1370_v16 = vpop.f32.mrf.mxu1  ;;  %2258 = vpow2.f32 %v1831_v44 }
0x113d   :  { %2260 = vpow2.f32 %v1834_v46 }
0x113e   :  { %v2101_v41 = vpop.f32.mrf.mxu1 }
0x1140   :  { %v2255_v42 = vpop.eup %2254 }
0x1141   :  { %1271 = vrot.lane.b32.xlu0 %v2255_v42, %s2324_s3 }
0x1148   :  { %v2257_v43 = vpop.eup %2256 }
0x1149   :  { %1383 = vrot.lane.b32.xlu1 %v2257_v43, %s2324_s3  ;;  %v2259_v47 = vpop.eup %2258 }
0x114a   :  { %v1265_v48 = vadd.f32 1.0, %v2259_v47  ;;  %v2261_v49 = vpop.eup %2260 }
0x114b   :  { %v1377_v50 = vadd.f32 1.0, %v2261_v49 }
0x114c   :  { %2262 = vrcp.f32 %v1265_v48 }
0x114d   :  { %2264 = vrcp.f32 %v1377_v50 }
0x1159   :  { %v2263_v22 = vpop.eup %2262 }
0x115a   :  { %v2265_v53 = vpop.eup %2264  ;;  %v1269_v58 = vmul.f32 %v2263_v22, %v2694_v5 }
0x115b   :  { %v1381_v62 = vmul.f32 %v2265_v53, %v2698_v10 }
0x11b3   :  { %v1272_v51 = vpop.permute.xlu0 %1271 }
0x11b4   :  { %v1274_v52 = vmul.f32 %v2263_v22, %v1272_v51 }
0x11b6   :  { %1276 = vrot.lane.b32.xlu0 %v1274_v52, %s2325_s13 }
0x11bb   :  { %v1384_v56 = vpop.permute.xlu1 %1383 }
0x11bc   :  { %v1386_v57 = vmul.f32 %v2265_v53, %v1384_v56 }
0x11be   :  { %1388 = vrot.lane.b32.xlu1 %v1386_v57, %s2325_s13 }
0x1228   :  { %v1277_v59 = vpop.permute.xlu0 %1276 }
0x1229   :  { %v2737_v60 = vadd.f32 %v1277_v59, %v1269_v58 }
0x122b   :  { %2266 = vtanh.f32 %v2737_v60 }
0x1230   :  { %v1389_v31 = vpop.permute.xlu1 %1388 }
0x1231   :  { %v2741_v63 = vadd.f32 %v1389_v31, %v1381_v62  ;;  %v2296_v31 = vld [vmem:[%s2834_s4 + $0x8] sm:$0xff]  }
0x1233   :  { %2268 = vtanh.f32 %v2741_v63 }
0x1238   :  { %v2267_v0 = vpop.eup %2266 }
0x1239   :  { %1282 = vrot.lane.b32.xlu0 %v2267_v0, %s2324_s3 }
0x1240   :  { %v2269_v1 = vpop.eup %2268 }
0x1241   :  { %1394 = vrot.lane.b32.xlu1 %v2269_v1, %s2324_s3 }
0x12ab   :  { %v1283_v2 = vpop.permute.xlu0 %1282 }
0x12ac   :  { %v2746_v3 = vmul.f32 %v2263_v22, %v1283_v2 }
0x12ae   :  { %v1286_v24 = vpack.c.bf16 %v2746_v3, %v2746_v3 }
0x12b0   :  { %1288 = vrot.lane.b32.xlu0 %v1286_v24, %s2325_s13 }
0x12b3   :  { %v1395_v4 = vpop.permute.xlu1 %1394 }
0x12b4   :  { %v1397_v5 = vmul.f32 %v2265_v53, %v1395_v4 }
0x12b6   :  { %v1398_v6 = vpack.c.bf16 %v1397_v5, %v1397_v5  ;;  %v2298_v5 = vld [vmem:[%s2836_s6] ss:$0 sm:$0xff] }
0x12b8   :  { %1400 = vrot.lane.b32.xlu1 %v1398_v6, %s2325_s13 }
0x1322   :  { %v1289_v7 = vpop.permute.xlu0 %1288 }
0x1323   :  { %2091 = vmatmul.mubr.msk.bf16.vlgmr.msra.gmra.mxu0 %vm167_vm3, %v1289_v7 }
0x1324   :  { %2103 = vmatpush3.bf16.msra.mxu0 %v2484_v54  ;;  %2106 = vmatprep.mubr.msk.bf16.mxu0 %vm2322_vm2, %v2321_v9  ;;  %v2295_v54 = vld [vmem:[%s2832_s2] sm:$0xff]  }
0x1325   :  { %2104 = vmatprep.subr.bf16.mxu0 %v2321_v9 }
0x1328   :  { %2105 = vmatpush3.bf16.msra.mxu0 %v2490_v55 }
0x1329   :  { %2118 = vmatprep.subr.bf16.mxu0 %v2321_v9 }
0x132a   :  { %v1401_v10 = vpop.permute.xlu1 %1400 }
0x132b   :  { %2107 = vmatmul.mubr.msk.bf16.vlgmr.msra.gmra.mxu0 %vm167_vm3, %v1401_v10 }
0x132c   :  { %2119 = vmatpush3.bf16.msra.mxu0 %v2294_v34  ;;  %2122 = vmatprep.mubr.msk.bf16.mxu0 %vm2322_vm2, %v2321_v9 }
0x132d   :  { %2120 = vmatprep.subr.bf16.mxu0 %v2321_v9 }
0x1330   :  { %2121 = vmatpush3.bf16.msra.mxu0 %v2295_v54 }
0x1333   :  { %2123 = vmatmul.mubr.msk.bf16.vlgmr.msra.gmra.mxu0 %vm167_vm3, %v1401_v10 }
0x13e3   :  { %v1327_v55 = vpop.f32.mrf.mxu0 }
0x13e4   :  { %v1328_v15 = vadd.f32 %v2514_v61, %v1327_v55 }
0x13e5   :  { %v2092_v11 = vpop.f32.mrf.mxu0 }
0x13e7   :  { %v1330_v13 = vpop.f32.mrf.mxu0 }
0x13e9   :  { %v2093_v14 = vpop.f32.mrf.mxu0 }
0x13eb   :  { %v1439_v27 = vpop.f32.mrf.mxu0 }
0x13ec   :  { %v1440_v18 = vadd.f32 %v1439_v27, %v1328_v15 }
0x13ed   :  { %v2108_v23 = vpop.f32.mrf.mxu0 }
0x13ee   :  { %2270 = vtanh.f32 %v1440_v18  ;;  %v1836_v61 = vmul.f32 -1.442695, %v1440_v18  ;;  %v1652_v23 = vpack.c.bf16 %v2574_v38, %v2531_v45  ;;  %v2165_v45 = vld [vmem:[%s2837_s7] sm:$0xff]  }
0x13ef   :  { %v1442_v20 = vpop.f32.mrf.mxu0 }
0x13f0   :  { %v1654_v20 = vpack.c.bf16 %v2746_v3, %v2703_v12  ;;  %v1653_v3 = vpack.c.bf16 %v2660_v21, %v2617_v30  ;;  %v1842_v30 = vld [vmem:[%s2838_s8] ss:$0 sm:$0xff]  ;;  %s2299_s8 = scalar_lea.vmem %s1782_s5, 1024 }
0x13f1   :  { %v2109_v17 = vpop.f32.mrf.mxu0  ;;  %p2300_p0 = scmp.ne.s32.totalorder %s1782_s5, %s2299_s8  ;;  %p2305_p2 = scmp.lt.s32.totalorder %s2299_s8, %s2299_s8 }
0x13f2   :  { %v2164_v17 = vld [vmem:[%s2837_s7 + $0x8] sm:$0xff]  }
0x13f3   :  { %v1550_v25 = vpop.f32.mrf.mxu0  ;;  %2134 = vmatprep.subr.bf16.mxu0 %v2164_v17  ;;  %p2306_p3 = por %p2305_p2, %p2304_p1 }
0x13f4   :  { %v1556_v26 = vadd.f32 %v1550_v25, %v2467_v28  ;;  %2135 = vmatpush3.bf16.msra.mxu0 %v2164_v17 }
0x13f5   :  { %v2124_v29 = vpop.f32.mrf.mxu0  ;;  %2136 = vmatprep.subr.bf16.mxu0 %v2165_v45  ;;  %p2307_p4 = pnand %p2306_p3, %p2300_p0 }
0x13f6   :  { %2272 = vtanh.f32 %v1556_v26  ;;  %v1839_v8 = vmul.f32 -1.442695, %v1556_v26 }
0x13f7   :  { %v1553_v19 = vpop.f32.mrf.mxu0  ;;  %2274 = vpow2.f32 %v1836_v61 }
0x13f8   :  { %2276 = vpow2.f32 %v1839_v8  ;;  %2137 = vmatpush3.bf16.msra.mxu0 %v2165_v45 }
0x13f9   :  { %v2125_v32 = vpop.f32.mrf.mxu0 }
0x13fb   :  { %v2271_v33 = vpop.eup %2270 }
0x13fc   :  { %1454 = vrot.lane.b32.xlu0 %v2271_v33, %s2324_s3 }
0x1403   :  { %v2273_v35 = vpop.eup %2272 }
0x1404   :  { %1566 = vrot.lane.b32.xlu1 %v2273_v35, %s2324_s3  ;;  %v2275_v36 = vpop.eup %2274 }
0x1405   :  { %v1448_v37 = vadd.f32 1.0, %v2275_v36  ;;  %v2277_v39 = vpop.eup %2276 }
0x1406   :  { %v1560_v40 = vadd.f32 1.0, %v2277_v39 }
0x1407   :  { %2278 = vrcp.f32 %v1448_v37 }
0x1408   :  { %2280 = vrcp.f32 %v1560_v40 }
0x1414   :  { %v2279_v28 = vpop.eup %2278 }
0x1415   :  { %v2281_v42 = vpop.eup %2280  ;;  %v1452_v46 = vmul.f32 %v2279_v28, %v2737_v60 }
0x1416   :  { %v1564_v49 = vmul.f32 %v2281_v42, %v2741_v63  ;;  %v2297_v63 = vld [vmem:[%s2834_s4] sm:$0xff]  }
0x146e   :  { %v1455_v16 = vpop.permute.xlu0 %1454 }
0x146f   :  { %v1457_v41 = vmul.f32 %v2279_v28, %v1455_v16 }
0x1471   :  { %1459 = vrot.lane.b32.xlu0 %v1457_v41, %s2325_s13 }
0x1476   :  { %v1567_v43 = vpop.permute.xlu1 %1566 }
0x1477   :  { %v1569_v44 = vmul.f32 %v2281_v42, %v1567_v43 }
0x1479   :  { %1571 = vrot.lane.b32.xlu1 %v1569_v44, %s2325_s13 }
0x14e3   :  { %v1460_v47 = vpop.permute.xlu0 %1459 }
0x14e4   :  { %v1462_v48 = vadd.f32 %v1460_v47, %v1452_v46 }
0x14e6   :  { %2282 = vtanh.f32 %v1462_v48 }
0x14eb   :  { %v1572_v50 = vpop.permute.xlu1 %1571 }
0x14ec   :  { %v1574_v22 = vadd.f32 %v1572_v50, %v1564_v49 }
0x14ee   :  { %2284 = vtanh.f32 %v1574_v22 }
0x14f3   :  { %v2283_v51 = vpop.eup %2282 }
0x14f4   :  { %1465 = vrot.lane.b32.xlu0 %v2283_v51, %s2324_s3 }
0x14fb   :  { %v2285_v52 = vpop.eup %2284 }
0x14fc   :  { %1577 = vrot.lane.b32.xlu1 %v2285_v52, %s2324_s3 }
0x1566   :  { %v1466_v53 = vpop.permute.xlu0 %1465 }
0x1567   :  { %v2780_v56 = vmul.f32 %v2279_v28, %v1466_v53 }
0x1569   :  { %v1469_v57 = vpack.c.bf16 %v2780_v56, %v2780_v56 }
0x156b   :  { %1471 = vrot.lane.b32.xlu0 %v1469_v57, %s2325_s13 }
0x156e   :  { %v1578_v58 = vpop.permute.xlu1 %1577 }
0x156f   :  { %v1580_v59 = vmul.f32 %v2281_v42, %v1578_v58 }
0x1571   :  { %v1581_v60 = vpack.c.bf16 %v1580_v59, %v1580_v59 }
0x1573   :  { %1583 = vrot.lane.b32.xlu1 %v1581_v60, %s2325_s13 }
0x15dd   :  { %v1472_v62 = vpop.permute.xlu0 %1471 }
0x15de   :  { %2115 = vmatmul.mubr.msk.bf16.vlgmr.msra.gmra.mxu1 %vm167_vm3, %v1472_v62 }
0x15df   :  { %2127 = vmatpush3.bf16.msra.mxu1 %v2296_v31  ;;  %2130 = vmatprep.mubr.msk.bf16.mxu1 %vm2322_vm2, %v2321_v9 }
0x15e0   :  { %2128 = vmatprep.subr.bf16.mxu1 %v2321_v9 }
0x15e3   :  { %2129 = vmatpush3.bf16.msra.mxu1 %v2297_v63 }
0x15e5   :  { %v1584_v0 = vpop.permute.xlu1 %1583 }
0x15e6   :  { %2131 = vmatmul.mubr.msk.bf16.vlgmr.msra.gmra.mxu1 %vm167_vm3, %v1584_v0 }
0x169e   :  { %v1510_v1 = vpop.f32.mrf.mxu1 }
0x169f   :  { %v1511_v6 = vadd.f32 %v2298_v5, %v1510_v1 }
0x16a0   :  { %v2116_v2 = vpop.f32.mrf.mxu1 }
0x16a2   :  { %v1513_v24 = vpop.f32.mrf.mxu1 }
0x16a4   :  { %v2117_v4 = vpop.f32.mrf.mxu1 }
0x16a6   :  { %v1622_v7 = vpop.f32.mrf.mxu1 }
0x16a7   :  { %v1623_v10 = vadd.f32 %v1622_v7, %v1511_v6 }
0x16a8   :  { %v2132_v9 = vpop.f32.mrf.mxu1 }
0x16a9   :  { %2286 = vtanh.f32 %v1623_v10  ;;  %v1841_v11 = vmul.f32 -1.442695, %v1623_v10 }
0x16aa   :  { %v1625_v34 = vpop.f32.mrf.mxu1 }
0x16ab   :  { %2288 = vpow2.f32 %v1841_v11 }
0x16ac   :  { %v2133_v54 = vpop.f32.mrf.mxu1 }
0x16b6   :  { %v2287_v55 = vpop.eup %2286 }
0x16b7   :  { %1637 = vrot.lane.b32.xlu0 %v2287_v55, %s2324_s3 }
0x16b8   :  { %v2289_v13 = vpop.eup %2288 }
0x16b9   :  { %v1631_v14 = vadd.f32 1.0, %v2289_v13 }
0x16bb   :  { %2290 = vrcp.f32 %v1631_v14 }
0x16c8   :  { %v2291_v15 = vpop.eup %2290 }
0x16c9   :  { %v1635_v25 = vmul.f32 %v2291_v15, %v1462_v48 }
0x1729   :  { %v1638_v27 = vpop.permute.xlu0 %1637 }
0x172a   :  { %v1640_v18 = vmul.f32 %v2291_v15, %v1638_v27 }
0x172c   :  { %1642 = vrot.lane.b32.xlu1 %v1640_v18, %s2325_s13 }
0x1730   :  { %1671 = vrot.lane.b32.xlu1 %v1652_v23, %s2325_s13 }
0x1734   :  { %1675 = vrot.lane.b32.xlu1 %v1654_v20, %s2325_s13 }
0x179e   :  { %v1643_v26 = vpop.permute.xlu1 %1642 }
0x179f   :  { %v1645_v29 = vadd.f32 %v1643_v26, %v1635_v25 }
0x17a1   :  { %2292 = vtanh.f32 %v1645_v29 }
0x17a2   :  { %v1672_v38 = vpop.permute.xlu1 %1671 }
0x17a3   :  { %2138 = vmatprep.mubr.msk.bf16.mxu0 %vm167_vm3, %v1672_v38 }
0x17a6   :  { %v1676_v61 = vpop.permute.xlu1 %1675 }
0x17ae   :  { %v2293_v12 = vpop.eup %2292 }
0x17af   :  { %1648 = vrot.lane.b32.xlu0 %v2293_v12, %s2324_s3 }
0x17b3   :  { %1673 = vrot.lane.b32.xlu0 %v1653_v3, %s2325_s13 }
0x1821   :  { %v1649_v19 = vpop.permute.xlu0 %1648 }
0x1822   :  { %v1651_v32 = vmul.f32 %v2291_v15, %v1649_v19 }
0x1824   :  { %v1655_v33 = vpack.c.bf16 %v1651_v32, %v2780_v56 }
0x1825   :  { %v1674_v35 = vpop.permute.xlu0 %1673 }
0x1826   :  { %1677 = vrot.lane.b32.xlu0 %v1655_v33, %s2325_s13  ;;  %2139 = vmatmul.mubr.msk.bf16.vlgmr.msra.gmra.mxu0 %vm167_vm3, %v1674_v35 }
0x1827   :  { %2142 = vmatprep.mubr.msk.bf16.mxu0 %vm167_vm3, %v1676_v61 }
0x1898   :  { %v1678_v8 = vpop.permute.xlu0 %1677 }
0x1899   :  { %2143 = vmatmul.mubr.msk.bf16.gmra.mxu0 %vm167_vm3, %v1678_v8 }
0x18e6   :  { %v2140_v21 = vpop.f32.mrf.mxu0 }
0x18e7   :  { %v1746_v36 = vadd.f32 %v2140_v21, %v1842_v30 }
0x18e8   :  { %v1737_v37 = vpop.f32.mrf.mxu0 }
0x18e9   :  { %1770 = vst [vmem:[#allocation2 + $0x10] sm:$0xff] %v1746_v36  ;;  %v1738_v39 = vadd.f32 %v1842_v30, %v1737_v37 }
0x18ea   :  { %v2141_v40 = vpop.f32.mrf.mxu0 }
0x18eb   :  { %1768 = vst [vmem:[#allocation2] sm:$0xff] %v1738_v39  ;;  %v1749_v28 = vadd.f32 %v2141_v40, %v1842_v30 }
0x18ec   :  { %v1740_v16 = vpop.f32.mrf.mxu0 }
0x18ed   :  { %1771 = vst [vmem:[#allocation2 + $0x18] sm:$0xff] %v1749_v28  ;;  %v1741_v41 = vadd.f32 %v1842_v30, %v1740_v16 }
0x18ef   :  { %1769 = vst [vmem:[#allocation2 + $0x8] sm:$0xff] %v1741_v41 }
0x1959   :  { %v2144_v42 = vpop.f32.mrf.mxu0 }
0x195a   :  { %v1762_v43 = vadd.f32 %v2144_v42, %v1842_v30 }
0x195b   :  { %v1753_v44 = vpop.f32.mrf.mxu0 }
0x195c   :  { %1774 = vst [vmem:[#allocation2 + $0x30] sm:$0xff] %v1762_v43  ;;  %v1754_v46 = vadd.f32 %v1842_v30, %v1753_v44 }
0x195d   :  { %v2145_v47 = vpop.f32.mrf.mxu0 }
0x195e   :  { %1772 = vst [vmem:[#allocation2 + $0x20] sm:$0xff] %v1754_v46  ;;  %v1765_v48 = vadd.f32 %v2145_v47, %v1842_v30 }
0x195f   :  { %v1756_v49 = vpop.f32.mrf.mxu0 }
0x1960   :  { %1775 = vst [vmem:[#allocation2 + $0x38] sm:$0xff] %v1765_v48  ;;  %v1757_v50 = vadd.f32 %v1842_v30, %v1756_v49 }
0x1962   :  { %1773 = vst [vmem:[#allocation2 + $0x28] sm:$0xff] %v1757_v50 }
0x1963   :  { %2310 = shalt.err (!%p2307_p4)
}
0x1964   :  { %s2327_s10 = smov 128   ;;  %s2328_s11 = smov 8  }
0x1965   :  { %1787 = dma.vmem_to_hbm [thread:$0]  %s1782_s5, 1024, %s2839_s9, [#allocation3], %s2327_s10, %s2327_s10, %s2328_s11  }
0x1966   :  { %2319 = dma.done.wait [#allocation3], 1024  }
0x1967   :  { %2320 = vsyncadd [#allocation3], 4294966272 }
0x1968   :  { %1791 = vsyncpa [#allocation3], 1 }

</bundles_post_ra>
